<compile_context>
chip_gen: v5e
topology: v5e:2x2
jax: 0.10.0
libtpu: 0.0.40
codegen_flags: <defaults>
</compile_context>

<pallas_src>
import functools
import math

import numpy as np
import jax
import jax.numpy as jnp
from jax import lax
from jax.experimental import pallas as pl
from jax.experimental.pallas import tpu as pltpu


_PER_LAYER = ("siw", "sib", "sow",
              "cqw", "cqb", "ckvw", "ckvb", "cow",
              "l1w", "l1b", "l2wT",
              "resb", "nw", "nb")
_CONST_W = ("hw", "hb")
_PACKED = _PER_LAYER + _CONST_W


def _layer_norm(x, w, b, eps=1e-5):
    """Two-pass LayerNorm over the last axis.  w, b: (1, D)."""
    mu = jnp.mean(x, axis=-1, keepdims=True)
    xc = x - mu
    var = jnp.mean(xc * xc, axis=-1, keepdims=True)
    return xc * lax.rsqrt(var + eps) * w + b


def _decoder_kernel(num_layers, num_heads, T,
                    tok_ref, feat_ref, tidc_ref, tidr_ref, fidr_ref, bidc_ref,
                    siw_ref, sib_ref, sow_ref,
                    cqw_ref, cqb_ref, ckvw_ref, ckvb_ref, cow_ref,
                    l1w_ref, l1b_ref, l2wT_ref,
                    resb_ref, nw_ref, nb_ref, hw_ref, hb_ref,
                    out_ref, x_ref, heads_ref):
    l = pl.program_id(1)                       # layer index (innermost grid axis)
    D = tok_ref.shape[-1]
    dh = D // num_heads
    NEG = jnp.float32(-1e30)
    nt = (((1,), (1,)), ((), ()))              # contract last dims of both: a @ b^T

    @pl.when(l == 0)
    def _():
        x_ref[...] = tok_ref[...]              # (re)start the carried state per block

    # Block-diagonal additive masks rebuilt in-kernel from tiny batch-id vectors
    # (tokens of batch b only attend to rows of batch b) — no quadratic mask DMA.
    self_bias = jnp.where(tidc_ref[...] == tidr_ref[...], 0.0, NEG)       # (R, R)
    cross_bias = jnp.where(tidc_ref[...] == fidr_ref[...], 0.0, NEG)      # (R, C)

    x = x_ref[...]                             # (R, D) f32 running token state
    mem = feat_ref[...]                        # (C, D) bf16 features of this block

    rb = resb_ref[...]                         # (3, D): [self-out b, cross-out b, linear2 b]
    nw = nw_ref[...]                           # (3, D): LayerNorm weights
    nb = nb_ref[...]

    def attention(q, k, v, bias, ow_ref):
        # q: (R, D); k, v: (C, D).  Softmax scale is pre-folded into the Q weights.
        qb = q.astype(jnp.bfloat16)
        kb = k.astype(jnp.bfloat16)
        vb = v.astype(jnp.bfloat16)
        # TODO(synk): check lowered MLIR for relayouts from the 8/32-lane q|k|v and
        # per-head slices; if present, pre-split the fused QKV weights at pack time.
        for h in range(num_heads):
            sl = slice(h * dh, (h + 1) * dh)
            s = lax.dot_general(qb[:, sl], kb[:, sl], nt,
                                preferred_element_type=jnp.float32)        # (R, C)
            s = s + bias
            s = s - jnp.max(s, axis=-1, keepdims=True)
            p = jnp.exp(s)
            p = p * pl.reciprocal(jnp.sum(p, axis=-1, keepdims=True), approx=True)
            heads_ref[:, sl] = jnp.dot(p.astype(jnp.bfloat16), vb[:, sl],
                                       preferred_element_type=jnp.float32)
        # One (R, D) @ (D, D) out-projection over the concatenated heads.
        return jnp.dot(heads_ref[...].astype(jnp.bfloat16), ow_ref[...],
                       preferred_element_type=jnp.float32)

    # ---- self-attention (fused QKV projection, bf16 weights, f32 accumulation) ----
    qkv = (jnp.dot(x.astype(jnp.bfloat16), siw_ref[...],
                   preferred_element_type=jnp.float32) + sib_ref[...])
    sa = attention(qkv[:, :D], qkv[:, D:2 * D], qkv[:, 2 * D:], self_bias, sow_ref)
    x = _layer_norm(x + sa + rb[0:1], nw[0:1], nb[0:1])

    # ---- cross-attention against the features (fused K/V projection) ----
    q = (jnp.dot(x.astype(jnp.bfloat16), cqw_ref[...],
                 preferred_element_type=jnp.float32) + cqb_ref[...])
    kv = (jnp.dot(mem, ckvw_ref[...],
                  preferred_element_type=jnp.float32) + ckvb_ref[...])
    ca = attention(q, kv[:, :D], kv[:, D:], cross_bias, cow_ref)
    x = _layer_norm(x + ca + rb[1:2], nw[1:2], nb[1:2])

    # ---- feed-forward (ReLU); bf16 weights, f32 accumulation, lane-dense linear2 ----
    h = (jnp.dot(x.astype(jnp.bfloat16), l1w_ref[...],
                 preferred_element_type=jnp.float32) + l1b_ref[...])
    h = jnp.maximum(h, 0.0).astype(jnp.bfloat16)
    ff = lax.dot_general(h, l2wT_ref[...], nt, preferred_element_type=jnp.float32)
    x = _layer_norm(x + ff + rb[2:3], nw[2:3], nb[2:3])

    x_ref[...] = x                              # carry to the next layer step

    # ---- last layer: mean-pool tokens per batch element, fused rot|trans head ----
    @pl.when(l == num_layers - 1)
    def _():
        poolm = jnp.where(bidc_ref[...] == tidr_ref[...], 1.0 / T, 0.0)    # (BB, R)
        pooled = jnp.dot(poolm, x, preferred_element_type=jnp.float32)     # (BB, D)
        out_ref[...] = (jnp.dot(pooled, hw_ref[...],
                                preferred_element_type=jnp.float32) + hb_ref[...])


def calibration_decoder(features, packed, *, num_heads, num_layers, batch_block=None):
    """features: (B, L, D) f32 -> (rotation (B, 3), translation (B, 3))."""
    B, L, D = features.shape
    tok = packed["tok"]                         # (T, D)
    T = tok.shape[0]
    assert D % num_heads == 0

    if batch_block is None:
        # Target ~128 result rows per grid step (MXU row fill); if that would leave a
        # single grid block while B > 1, split in two so the "parallel" axis can be
        # sharded over v7x's two TensorCores.
        batch_block = max(1, min(B, max(1, 128 // T)))
        if B > 1 and pl.cdiv(B, batch_block) == 1:
            batch_block = -(-B // 2)
    BB = min(B, batch_block)
    n_blocks = pl.cdiv(B, BB)
    B_pad = n_blocks * BB
    if B_pad != B:                              # zero-pad so every grid block is full
        features = jnp.concatenate(
            [features, jnp.zeros((B_pad - B, L, D), features.dtype)], axis=0)

    # bf16 features (halved DMA / VMEM); one (BB*L, D) slab per batch block.
    feat = features.astype(jnp.bfloat16).reshape(n_blocks, BB * L, D)
    tok_flat = jnp.tile(tok, (BB, 1))           # (BB*T, D) f32

    # Tiny batch-id vectors; the quadratic masks are rebuilt in-kernel by broadcast.
    tid = (np.arange(BB * T) // T).astype(np.float32)
    fid = (np.arange(BB * L) // L).astype(np.float32)
    tid_col = jnp.asarray(tid[:, None])         # (R, 1)
    tid_row = jnp.asarray(tid[None, :])         # (1, R)
    fid_row = jnp.asarray(fid[None, :])         # (1, C)
    bid_col = jnp.asarray(np.arange(BB, dtype=np.float32)[:, None])   # (BB, 1)

    weights = [packed[n] for n in _PACKED]
    operands = [tok_flat, feat, tid_col, tid_row, fid_row, bid_col] + weights

    def const_spec(a):
        nd = a.ndim
        return pl.BlockSpec(a.shape, lambda i, l, _nd=nd: (0,) * _nd)

    def layer_spec(a):
        nd = a.ndim
        return pl.BlockSpec((None,) + a.shape[1:],
                            lambda i, l, _nd=nd: (l,) + (0,) * (_nd - 1))

    w_specs = [layer_spec(packed[n]) if n in _PER_LAYER else const_spec(packed[n])
               for n in _PACKED]
    in_specs = ([const_spec(tok_flat),
                 pl.BlockSpec((None, BB * L, D), lambda i, l: (i, 0, 0)),
                 const_spec(tid_col), const_spec(tid_row),
                 const_spec(fid_row), const_spec(bid_col)]
                + w_specs)
    out_specs = pl.BlockSpec((None, BB, 8), lambda i, l: (i, 0, 0))
    out_shape = jax.ShapeDtypeStruct((n_blocks, BB, 8), jnp.float32)

    kernel = functools.partial(_decoder_kernel, num_layers, num_heads, T)
    out = pl.pallas_call(
        kernel,
        grid=(n_blocks, num_layers),
        in_specs=in_specs,
        out_specs=out_specs,
        out_shape=out_shape,
        scratch_shapes=[pltpu.VMEM((BB * T, D), jnp.float32),   # x carried across layers
                        pltpu.VMEM((BB * T, D), jnp.float32)],  # per-head output concat
        compiler_params=pltpu.CompilerParams(
            dimension_semantics=("parallel", "arbitrary")),
    )(*operands)
    out = out.reshape(B_pad, 8)[:B]
    return out[:, 0:3], out[:, 3:6]


# ----------------------------------------------------------------------------------
# Parameter construction (deterministic synthetic init; weights stored pre-transposed
# so the kernel computes x @ W), plus packing into the kernel's fused bf16 layout.
# ----------------------------------------------------------------------------------
def init_raw_params(key, *, D, T, FF, num_layers):
    def nrm(k, shape, scale=0.02):
        return (scale * jax.random.normal(k, shape)).astype(jnp.float32)

    ks = iter(jax.random.split(key, 24))
    p = {}
    p["tokens"] = jax.random.normal(next(ks), (1, T, D), dtype=jnp.float32)
    p["siw"] = nrm(next(ks), (num_layers, D, 3 * D))
    p["sib"] = nrm(next(ks), (num_layers, 3 * D))
    p["sow"] = nrm(next(ks), (num_layers, D, D))
    p["sob"] = nrm(next(ks), (num_layers, D))
    p["ciw"] = nrm(next(ks), (num_layers, D, 3 * D))
    p["cib"] = nrm(next(ks), (num_layers, 3 * D))
    p["cow"] = nrm(next(ks), (num_layers, D, D))
    p["cob"] = nrm(next(ks), (num_layers, D))
    p["l1w"] = nrm(next(ks), (num_layers, D, FF))
    p["l1b"] = nrm(next(ks), (num_layers, FF))
    p["l2w"] = nrm(next(ks), (num_layers, FF, D))
    p["l2b"] = nrm(next(ks), (num_layers, D))
    for n in ("n1", "n2", "n3"):
        p[n + "w"] = jnp.ones((num_layers, D), jnp.float32)
        p[n + "b"] = jnp.zeros((num_layers, D), jnp.float32)
    p["rw"] = nrm(next(ks), (D, 3))
    p["rb"] = nrm(next(ks), (3,))
    p["tw"] = nrm(next(ks), (D, 3))
    p["tb"] = nrm(next(ks), (3,))
    return p


def pack_params(raw, num_heads):
    NL, D, _ = raw["sow"].shape
    dh = D // num_heads
    scale = 1.0 / math.sqrt(dh)
    bf16 = jnp.bfloat16
    p = {}
    p["tok"] = raw["tokens"][0]                                          # (T, D) f32
    # softmax 1/sqrt(dh) folded into the Q projection weights & biases (exact).
    siw = jnp.concatenate([raw["siw"][:, :, :D] * scale, raw["siw"][:, :, D:]], axis=-1)
    sib = jnp.concatenate([raw["sib"][:, :D] * scale, raw["sib"][:, D:]], axis=-1)
    p["siw"] = siw.astype(bf16)                                          # (NL, D, 3D)
    p["sib"] = sib[:, None, :]                                           # (NL, 1, 3D) f32
    p["sow"] = raw["sow"].astype(bf16)                                   # (NL, D, D)
    p["cqw"] = (raw["ciw"][:, :, :D] * scale).astype(bf16)               # (NL, D, D)
    p["cqb"] = raw["cib"][:, None, :D] * scale                           # (NL, 1, D)
    p["ckvw"] = raw["ciw"][:, :, D:].astype(bf16)                        # (NL, D, 2D)
    p["ckvb"] = raw["cib"][:, None, D:]                                  # (NL, 1, 2D)
    p["cow"] = raw["cow"].astype(bf16)                                   # (NL, D, D)
    p["l1w"] = raw["l1w"].astype(bf16)                                   # (NL, D, FF)
    p["l1b"] = raw["l1b"][:, None, :]                                    # (NL, 1, FF)
    # linear2 stored pre-transposed (lane dim = FF, fully dense) for an NT dot.
    p["l2wT"] = jnp.transpose(raw["l2w"], (0, 2, 1)).astype(bf16)        # (NL, D, FF)
    p["resb"] = jnp.stack([raw["sob"], raw["cob"], raw["l2b"]], axis=1)  # (NL, 3, D)
    p["nw"] = jnp.stack([raw["n1w"], raw["n2w"], raw["n3w"]], axis=1)    # (NL, 3, D)
    p["nb"] = jnp.stack([raw["n1b"], raw["n2b"], raw["n3b"]], axis=1)    # (NL, 3, D)
    hw = jnp.zeros((D, 8), jnp.float32)
    hw = hw.at[:, 0:3].set(raw["rw"]).at[:, 3:6].set(raw["tw"])          # fused rot|trans head
    hb = jnp.zeros((1, 8), jnp.float32)
    hb = hb.at[0, 0:3].set(raw["rb"]).at[0, 3:6].set(raw["tb"])
    p["hw"], p["hb"] = hw, hb
    return p


# ----------------------------------------------------------------------------------
# Pure-JAX f32 reference with nn.TransformerDecoder(Layer) eval semantics.
# ----------------------------------------------------------------------------------
def reference(features, raw, num_heads, num_layers):
    def ln(x, w, b, eps=1e-5):
        mu = x.mean(-1, keepdims=True)
        var = ((x - mu) ** 2).mean(-1, keepdims=True)
        return (x - mu) / jnp.sqrt(var + eps) * w + b

    def mha(q_in, kv_in, in_wT, in_b, out_wT, out_b, H):
        D = q_in.shape[-1]
        dh = D // H
        q = q_in @ in_wT[:, :D] + in_b[:D]
        k = kv_in @ in_wT[:, D:2 * D] + in_b[D:2 * D]
        v = kv_in @ in_wT[:, 2 * D:] + in_b[2 * D:]
        outs = []
        for h in range(H):
            sl = slice(h * dh, (h + 1) * dh)
            p = jax.nn.softmax((q[:, sl] @ k[:, sl].T) / math.sqrt(dh), axis=-1)
            outs.append(p @ v[:, sl])
        return jnp.concatenate(outs, -1) @ out_wT + out_b

    rots, trs = [], []
    for b in range(features.shape[0]):
        x = raw["tokens"][0]
        mem = features[b]
        for l in range(num_layers):
            sa = mha(x, x, raw["siw"][l], raw["sib"][l], raw["sow"][l], raw["sob"][l], num_heads)
            x = ln(x + sa, raw["n1w"][l], raw["n1b"][l])
            ca = mha(x, mem, raw["ciw"][l], raw["cib"][l], raw["cow"][l], raw["cob"][l], num_heads)
            x = ln(x + ca, raw["n2w"][l], raw["n2b"][l])
            h = jnp.maximum(x @ raw["l1w"][l] + raw["l1b"][l], 0.0)
            x = ln(x + h @ raw["l2w"][l] + raw["l2b"][l], raw["n3w"][l], raw["n3b"][l])
        pooled = x.mean(0)
        rots.append(pooled @ raw["rw"] + raw["rb"])
        trs.append(pooled @ raw["tw"] + raw["tb"])
    return jnp.stack(rots), jnp.stack(trs)


if __name__ == "__main__":
    # Small shapes consistent with the module: batch=2, feature_length=16,
    # embedding_dim=32, 4 calibration tokens, 4 heads (head_dim=8), 2 decoder
    # layers, dim_feedforward=2048 (PyTorch default).
    B, L, D, T, H, NL, FF = 2, 16, 32, 4, 4, 2, 2048

    key = jax.random.PRNGKey(0)
    kp, kf = jax.random.split(key)
    raw = init_raw_params(kp, D=D, T=T, FF=FF, num_layers=NL)
    packed = pack_params(raw, num_heads=H)
    features = jax.random.normal(kf, (B, L, D), dtype=jnp.float32)

    ref_rot, ref_tr = reference(features, raw, H, NL)

    # Default tiling: 2 batch blocks -> the "parallel" axis can use both v7x cores.
    rot, tr = calibration_decoder(features, packed, num_heads=H, num_layers=NL)
    jax.block_until_ready((rot, tr))
    assert rot.shape == (B, 3) and tr.shape == (B, 3)
    np.testing.assert_allclose(np.asarray(rot), np.asarray(ref_rot), rtol=5e-2, atol=5e-3)
    np.testing.assert_allclose(np.asarray(tr), np.asarray(ref_tr), rtol=5e-2, atol=5e-3)

    # Single-block tiling (whole batch in one grid step) exercises BB > 1.
    rot2, tr2 = calibration_decoder(features, packed, num_heads=H, num_layers=NL,
                                    batch_block=B)
    jax.block_until_ready((rot2, tr2))
    np.testing.assert_allclose(np.asarray(rot2), np.asarray(ref_rot), rtol=5e-2, atol=5e-3)
    np.testing.assert_allclose(np.asarray(tr2), np.asarray(ref_tr), rtol=5e-2, atol=5e-3)

    print("KERNEL_OK")
</pallas_src>

<mosaic_0001>
module attributes {stable_mosaic.version = 11 : i64} {
  func.func @_decoder_kernel(%arg0: i32, %arg1: i32, %arg2: memref<4x32xf32, #tpu.memory_space<vmem>>, %arg3: memref<1x16x32xbf16, #tpu.memory_space<vmem>>, %arg4: memref<4x1xf32, #tpu.memory_space<vmem>>, %arg5: memref<1x4xf32, #tpu.memory_space<vmem>>, %arg6: memref<1x16xf32, #tpu.memory_space<vmem>>, %arg7: memref<1x1xf32, #tpu.memory_space<vmem>>, %arg8: memref<1x32x96xbf16, #tpu.memory_space<vmem>>, %arg9: memref<1x1x96xf32, #tpu.memory_space<vmem>>, %arg10: memref<1x32x32xbf16, #tpu.memory_space<vmem>>, %arg11: memref<1x32x32xbf16, #tpu.memory_space<vmem>>, %arg12: memref<1x1x32xf32, #tpu.memory_space<vmem>>, %arg13: memref<1x32x64xbf16, #tpu.memory_space<vmem>>, %arg14: memref<1x1x64xf32, #tpu.memory_space<vmem>>, %arg15: memref<1x32x32xbf16, #tpu.memory_space<vmem>>, %arg16: memref<1x32x2048xbf16, #tpu.memory_space<vmem>>, %arg17: memref<1x1x2048xf32, #tpu.memory_space<vmem>>, %arg18: memref<1x32x2048xbf16, #tpu.memory_space<vmem>>, %arg19: memref<1x3x32xf32, #tpu.memory_space<vmem>>, %arg20: memref<1x3x32xf32, #tpu.memory_space<vmem>>, %arg21: memref<1x3x32xf32, #tpu.memory_space<vmem>>, %arg22: memref<32x8xf32, #tpu.memory_space<vmem>>, %arg23: memref<1x8xf32, #tpu.memory_space<vmem>>, %arg24: memref<1x1x8xf32, #tpu.memory_space<vmem>>, %arg25: memref<4x32xf32, #tpu.memory_space<vmem>>, %arg26: memref<4x32xf32, #tpu.memory_space<vmem>>) attributes {dimension_semantics = [#tpu.dimension_semantics<parallel>, #tpu.dimension_semantics<arbitrary>], iteration_bounds = array<i64: 2, 2>, scalar_prefetch = 0 : i64, scratch_operands = 2 : i64, tpu.core_type = #tpu.core_type<tc>, window_params = [{pipeline_mode = #tpu.pipeline_mode<synchronous>, transform_indices = @transform_0, window_bounds = array<i64: 4, 32>}, {transform_indices = @transform_1, window_bounds = array<i64: 1, 16, 32>}, {pipeline_mode = #tpu.pipeline_mode<synchronous>, transform_indices = @transform_2, window_bounds = array<i64: 4, 1>}, {pipeline_mode = #tpu.pipeline_mode<synchronous>, transform_indices = @transform_3, window_bounds = array<i64: 1, 4>}, {pipeline_mode = #tpu.pipeline_mode<synchronous>, transform_indices = @transform_4, window_bounds = array<i64: 1, 16>}, {pipeline_mode = #tpu.pipeline_mode<synchronous>, transform_indices = @transform_5, window_bounds = array<i64: 1, 1>}, {transform_indices = @transform_6, window_bounds = array<i64: 1, 32, 96>}, {transform_indices = @transform_7, window_bounds = array<i64: 1, 1, 96>}, {transform_indices = @transform_8, window_bounds = array<i64: 1, 32, 32>}, {transform_indices = @transform_9, window_bounds = array<i64: 1, 32, 32>}, {transform_indices = @transform_10, window_bounds = array<i64: 1, 1, 32>}, {transform_indices = @transform_11, window_bounds = array<i64: 1, 32, 64>}, {transform_indices = @transform_12, window_bounds = array<i64: 1, 1, 64>}, {transform_indices = @transform_13, window_bounds = array<i64: 1, 32, 32>}, {transform_indices = @transform_14, window_bounds = array<i64: 1, 32, 2048>}, {transform_indices = @transform_15, window_bounds = array<i64: 1, 1, 2048>}, {transform_indices = @transform_16, window_bounds = array<i64: 1, 32, 2048>}, {transform_indices = @transform_17, window_bounds = array<i64: 1, 3, 32>}, {transform_indices = @transform_18, window_bounds = array<i64: 1, 3, 32>}, {transform_indices = @transform_19, window_bounds = array<i64: 1, 3, 32>}, {pipeline_mode = #tpu.pipeline_mode<synchronous>, transform_indices = @transform_20, window_bounds = array<i64: 32, 8>}, {pipeline_mode = #tpu.pipeline_mode<synchronous>, transform_indices = @transform_21, window_bounds = array<i64: 1, 8>}, {transform_indices = @transform_22, window_bounds = array<i64: 1, 1, 8>}]} {
    %c0_i32 = arith.constant 0 : i32
    %0 = arith.cmpi eq, %arg1, %c0_i32 : i32
    %1 = arith.extui %0 : i1 to i32
    %c0_i32_0 = arith.constant 0 : i32
    %2 = arith.cmpi ne, %1, %c0_i32_0 : i32
    scf.if %2 {
      %c0_133 = arith.constant 0 : index
      %c0_134 = arith.constant 0 : index
      %312 = vector.load %arg2[%c0_133, %c0_134] : memref<4x32xf32, #tpu.memory_space<vmem>>, vector<4x32xf32>
      %c0_135 = arith.constant 0 : index
      %c0_136 = arith.constant 0 : index
      %313 = vector.load %arg25[%c0_135, %c0_136] : memref<4x32xf32, #tpu.memory_space<vmem>>, vector<4x32xf32>
      tpu.vector_store %arg25[%c0_135, %c0_136], %312 {strides = array<i32>} : memref<4x32xf32, #tpu.memory_space<vmem>>, vector<4x32xf32>,
    } else {
    }
    %c0 = arith.constant 0 : index
    %c0_1 = arith.constant 0 : index
    %3 = vector.load %arg4[%c0, %c0_1] : memref<4x1xf32, #tpu.memory_space<vmem>>, vector<4x1xf32>
    %c0_2 = arith.constant 0 : index
    %c0_3 = arith.constant 0 : index
    %4 = vector.load %arg5[%c0_2, %c0_3] : memref<1x4xf32, #tpu.memory_space<vmem>>, vector<1x4xf32>
    %5 = vector.broadcast %3 : vector<4x1xf32> to vector<4x4xf32>
    %6 = vector.broadcast %4 : vector<1x4xf32> to vector<4x4xf32>
    %7 = arith.cmpf oeq, %5, %6 : vector<4x4xf32>
    %cst = arith.constant 0.000000e+00 : f32
    %cst_4 = arith.constant -1.000000e+30 : f32
    %8 = vector.broadcast %cst : f32 to vector<4x4xf32>
    %9 = vector.broadcast %cst_4 : f32 to vector<4x4xf32>
    %10 = arith.select %7, %8, %9 : vector<4x4xi1>, vector<4x4xf32>
    %c0_5 = arith.constant 0 : index
    %c0_6 = arith.constant 0 : index
    %11 = vector.load %arg4[%c0_5, %c0_6] : memref<4x1xf32, #tpu.memory_space<vmem>>, vector<4x1xf32>
    %c0_7 = arith.constant 0 : index
    %c0_8 = arith.constant 0 : index
    %12 = vector.load %arg6[%c0_7, %c0_8] : memref<1x16xf32, #tpu.memory_space<vmem>>, vector<1x16xf32>
    %13 = vector.broadcast %11 : vector<4x1xf32> to vector<4x16xf32>
    %14 = vector.broadcast %12 : vector<1x16xf32> to vector<4x16xf32>
    %15 = arith.cmpf oeq, %13, %14 : vector<4x16xf32>
    %cst_9 = arith.constant 0.000000e+00 : f32
    %cst_10 = arith.constant -1.000000e+30 : f32
    %16 = vector.broadcast %cst_9 : f32 to vector<4x16xf32>
    %17 = vector.broadcast %cst_10 : f32 to vector<4x16xf32>
    %18 = arith.select %15, %16, %17 : vector<4x16xi1>, vector<4x16xf32>
    %c0_11 = arith.constant 0 : index
    %c0_12 = arith.constant 0 : index
    %19 = vector.load %arg25[%c0_11, %c0_12] : memref<4x32xf32, #tpu.memory_space<vmem>>, vector<4x32xf32>
    %c0_13 = arith.constant 0 : index
    %c0_14 = arith.constant 0 : index
    %c0_15 = arith.constant 0 : index
    %20 = vector.load %arg3[%c0_13, %c0_14, %c0_15] : memref<1x16x32xbf16, #tpu.memory_space<vmem>>, vector<1x16x32xbf16>
    %21 = vector.shape_cast %20 : vector<1x16x32xbf16> to vector<16x32xbf16>
    %c0_16 = arith.constant 0 : index
    %c0_17 = arith.constant 0 : index
    %c0_18 = arith.constant 0 : index
    %22 = vector.load %arg19[%c0_16, %c0_17, %c0_18] : memref<1x3x32xf32, #tpu.memory_space<vmem>>, vector<1x3x32xf32>
    %23 = vector.shape_cast %22 : vector<1x3x32xf32> to vector<3x32xf32>
    %c0_19 = arith.constant 0 : index
    %c0_20 = arith.constant 0 : index
    %c0_21 = arith.constant 0 : index
    %24 = vector.load %arg20[%c0_19, %c0_20, %c0_21] : memref<1x3x32xf32, #tpu.memory_space<vmem>>, vector<1x3x32xf32>
    %25 = vector.shape_cast %24 : vector<1x3x32xf32> to vector<3x32xf32>
    %c0_22 = arith.constant 0 : index
    %c0_23 = arith.constant 0 : index
    %c0_24 = arith.constant 0 : index
    %26 = vector.load %arg21[%c0_22, %c0_23, %c0_24] : memref<1x3x32xf32, #tpu.memory_space<vmem>>, vector<1x3x32xf32>
    %27 = vector.shape_cast %26 : vector<1x3x32xf32> to vector<3x32xf32>
    %28 = arith.truncf %19 : vector<4x32xf32> to vector<4x32xbf16>
    %c0_25 = arith.constant 0 : index
    %c0_26 = arith.constant 0 : index
    %c0_27 = arith.constant 0 : index
    %29 = vector.load %arg8[%c0_25, %c0_26, %c0_27] : memref<1x32x96xbf16, #tpu.memory_space<vmem>>, vector<1x32x96xbf16>
    %30 = vector.shape_cast %29 : vector<1x32x96xbf16> to vector<32x96xbf16>
    %cst_28 = arith.constant dense<0.000000e+00> : vector<4x96xf32>
    %31 = tpu.matmul %28, %30, %cst_28 {dimension_numbers = #tpu.dot_dimension_numbers<[1], [0], [0], [1], [0, 0, 1, 1], [], []>} : vector<4x32xbf16>, vector<32x96xbf16>, vector<4x96xf32> -> vector<4x96xf32>
    %c0_29 = arith.constant 0 : index
    %c0_30 = arith.constant 0 : index
    %c0_31 = arith.constant 0 : index
    %32 = vector.load %arg9[%c0_29, %c0_30, %c0_31] : memref<1x1x96xf32, #tpu.memory_space<vmem>>, vector<1x1x96xf32>
    %33 = vector.shape_cast %32 : vector<1x1x96xf32> to vector<1x96xf32>
    %34 = vector.broadcast %33 : vector<1x96xf32> to vector<4x96xf32>
    %35 = arith.addf %31, %34 : vector<4x96xf32>
    %36 = vector.extract_strided_slice %35 {offsets = [0, 0], sizes = [4, 32], strides = [1, 1]} : vector<4x96xf32> to vector<4x32xf32>
    %37 = vector.extract_strided_slice %35 {offsets = [0, 32], sizes = [4, 32], strides = [1, 1]} : vector<4x96xf32> to vector<4x32xf32>
    %38 = vector.extract_strided_slice %35 {offsets = [0, 64], sizes = [4, 32], strides = [1, 1]} : vector<4x96xf32> to vector<4x32xf32>
    %39 = arith.truncf %36 : vector<4x32xf32> to vector<4x32xbf16>
    %40 = arith.truncf %37 : vector<4x32xf32> to vector<4x32xbf16>
    %41 = arith.truncf %38 : vector<4x32xf32> to vector<4x32xbf16>
    %42 = vector.extract_strided_slice %39 {offsets = [0, 0], sizes = [4, 8], strides = [1, 1]} : vector<4x32xbf16> to vector<4x8xbf16>
    %43 = vector.extract_strided_slice %40 {offsets = [0, 0], sizes = [4, 8], strides = [1, 1]} : vector<4x32xbf16> to vector<4x8xbf16>
    %cst_32 = arith.constant dense<0.000000e+00> : vector<4x4xf32>
    %44 = tpu.matmul %42, %43, %cst_32 {dimension_numbers = #tpu.dot_dimension_numbers<[1], [1], [0], [0], [0, 0, 1, 0], [], []>} : vector<4x8xbf16>, vector<4x8xbf16>, vector<4x4xf32> -> vector<4x4xf32>
    %45 = arith.addf %44, %10 : vector<4x4xf32>
    %cst_33 = arith.constant dense<0xFF800000> : vector<4xf32>
    %46 = vector.multi_reduction <maximumf>, %45, %cst_33 [1] : vector<4x4xf32> to vector<4xf32>
    %47 = vector.shape_cast %46 : vector<4xf32> to vector<4x1xf32>
    %48 = vector.broadcast %47 : vector<4x1xf32> to vector<4x4xf32>
    %49 = arith.subf %45, %48 : vector<4x4xf32>
    %50 = math.exp %49 : vector<4x4xf32>
    %cst_34 = arith.constant dense<0.000000e+00> : vector<4xf32>
    %51 = vector.multi_reduction <add>, %50, %cst_34 [1] : vector<4x4xf32> to vector<4xf32>
    %52 = vector.shape_cast %51 : vector<4xf32> to vector<4x1xf32>
    %53 = tpu.reciprocal %52 {approx = true} : vector<4x1xf32> -> vector<4x1xf32>
    %54 = vector.broadcast %53 : vector<4x1xf32> to vector<4x4xf32>
    %55 = arith.mulf %50, %54 : vector<4x4xf32>
    %56 = arith.truncf %55 : vector<4x4xf32> to vector<4x4xbf16>
    %57 = vector.extract_strided_slice %41 {offsets = [0, 0], sizes = [4, 8], strides = [1, 1]} : vector<4x32xbf16> to vector<4x8xbf16>
    %cst_35 = arith.constant dense<0.000000e+00> : vector<4x8xf32>
    %58 = tpu.matmul %56, %57, %cst_35 {dimension_numbers = #tpu.dot_dimension_numbers<[1], [0], [0], [1], [0, 0, 1, 1], [], []>} : vector<4x4xbf16>, vector<4x8xbf16>, vector<4x8xf32> -> vector<4x8xf32>
    %c0_36 = arith.constant 0 : index
    %c0_37 = arith.constant 0 : index
    %59 = vector.load %arg26[%c0_36, %c0_37] : memref<4x32xf32, #tpu.memory_space<vmem>>, vector<4x8xf32>
    tpu.vector_store %arg26[%c0_36, %c0_37], %58 {strides = array<i32>} : memref<4x32xf32, #tpu.memory_space<vmem>>, vector<4x8xf32>,
    %60 = vector.extract_strided_slice %39 {offsets = [0, 8], sizes = [4, 8], strides = [1, 1]} : vector<4x32xbf16> to vector<4x8xbf16>
    %61 = vector.extract_strided_slice %40 {offsets = [0, 8], sizes = [4, 8], strides = [1, 1]} : vector<4x32xbf16> to vector<4x8xbf16>
    %cst_38 = arith.constant dense<0.000000e+00> : vector<4x4xf32>
    %62 = tpu.matmul %60, %61, %cst_38 {dimension_numbers = #tpu.dot_dimension_numbers<[1], [1], [0], [0], [0, 0, 1, 0], [], []>} : vector<4x8xbf16>, vector<4x8xbf16>, vector<4x4xf32> -> vector<4x4xf32>
    %63 = arith.addf %62, %10 : vector<4x4xf32>
    %cst_39 = arith.constant dense<0xFF800000> : vector<4xf32>
    %64 = vector.multi_reduction <maximumf>, %63, %cst_39 [1] : vector<4x4xf32> to vector<4xf32>
    %65 = vector.shape_cast %64 : vector<4xf32> to vector<4x1xf32>
    %66 = vector.broadcast %65 : vector<4x1xf32> to vector<4x4xf32>
    %67 = arith.subf %63, %66 : vector<4x4xf32>
    %68 = math.exp %67 : vector<4x4xf32>
    %cst_40 = arith.constant dense<0.000000e+00> : vector<4xf32>
    %69 = vector.multi_reduction <add>, %68, %cst_40 [1] : vector<4x4xf32> to vector<4xf32>
    %70 = vector.shape_cast %69 : vector<4xf32> to vector<4x1xf32>
    %71 = tpu.reciprocal %70 {approx = true} : vector<4x1xf32> -> vector<4x1xf32>
    %72 = vector.broadcast %71 : vector<4x1xf32> to vector<4x4xf32>
    %73 = arith.mulf %68, %72 : vector<4x4xf32>
    %74 = arith.truncf %73 : vector<4x4xf32> to vector<4x4xbf16>
    %75 = vector.extract_strided_slice %41 {offsets = [0, 8], sizes = [4, 8], strides = [1, 1]} : vector<4x32xbf16> to vector<4x8xbf16>
    %cst_41 = arith.constant dense<0.000000e+00> : vector<4x8xf32>
    %76 = tpu.matmul %74, %75, %cst_41 {dimension_numbers = #tpu.dot_dimension_numbers<[1], [0], [0], [1], [0, 0, 1, 1], [], []>} : vector<4x4xbf16>, vector<4x8xbf16>, vector<4x8xf32> -> vector<4x8xf32>
    %c0_42 = arith.constant 0 : index
    %c8 = arith.constant 8 : index
    %77 = vector.load %arg26[%c0_42, %c8] : memref<4x32xf32, #tpu.memory_space<vmem>>, vector<4x8xf32>
    tpu.vector_store %arg26[%c0_42, %c8], %76 {strides = array<i32>} : memref<4x32xf32, #tpu.memory_space<vmem>>, vector<4x8xf32>,
    %78 = vector.extract_strided_slice %39 {offsets = [0, 16], sizes = [4, 8], strides = [1, 1]} : vector<4x32xbf16> to vector<4x8xbf16>
    %79 = vector.extract_strided_slice %40 {offsets = [0, 16], sizes = [4, 8], strides = [1, 1]} : vector<4x32xbf16> to vector<4x8xbf16>
    %cst_43 = arith.constant dense<0.000000e+00> : vector<4x4xf32>
    %80 = tpu.matmul %78, %79, %cst_43 {dimension_numbers = #tpu.dot_dimension_numbers<[1], [1], [0], [0], [0, 0, 1, 0], [], []>} : vector<4x8xbf16>, vector<4x8xbf16>, vector<4x4xf32> -> vector<4x4xf32>
    %81 = arith.addf %80, %10 : vector<4x4xf32>
    %cst_44 = arith.constant dense<0xFF800000> : vector<4xf32>
    %82 = vector.multi_reduction <maximumf>, %81, %cst_44 [1] : vector<4x4xf32> to vector<4xf32>
    %83 = vector.shape_cast %82 : vector<4xf32> to vector<4x1xf32>
    %84 = vector.broadcast %83 : vector<4x1xf32> to vector<4x4xf32>
    %85 = arith.subf %81, %84 : vector<4x4xf32>
    %86 = math.exp %85 : vector<4x4xf32>
    %cst_45 = arith.constant dense<0.000000e+00> : vector<4xf32>
    %87 = vector.multi_reduction <add>, %86, %cst_45 [1] : vector<4x4xf32> to vector<4xf32>
    %88 = vector.shape_cast %87 : vector<4xf32> to vector<4x1xf32>
    %89 = tpu.reciprocal %88 {approx = true} : vector<4x1xf32> -> vector<4x1xf32>
    %90 = vector.broadcast %89 : vector<4x1xf32> to vector<4x4xf32>
    %91 = arith.mulf %86, %90 : vector<4x4xf32>
    %92 = arith.truncf %91 : vector<4x4xf32> to vector<4x4xbf16>
    %93 = vector.extract_strided_slice %41 {offsets = [0, 16], sizes = [4, 8], strides = [1, 1]} : vector<4x32xbf16> to vector<4x8xbf16>
    %cst_46 = arith.constant dense<0.000000e+00> : vector<4x8xf32>
    %94 = tpu.matmul %92, %93, %cst_46 {dimension_numbers = #tpu.dot_dimension_numbers<[1], [0], [0], [1], [0, 0, 1, 1], [], []>} : vector<4x4xbf16>, vector<4x8xbf16>, vector<4x8xf32> -> vector<4x8xf32>
    %c0_47 = arith.constant 0 : index
    %c16 = arith.constant 16 : index
    %95 = vector.load %arg26[%c0_47, %c16] : memref<4x32xf32, #tpu.memory_space<vmem>>, vector<4x8xf32>
    tpu.vector_store %arg26[%c0_47, %c16], %94 {strides = array<i32>} : memref<4x32xf32, #tpu.memory_space<vmem>>, vector<4x8xf32>,
    %96 = vector.extract_strided_slice %39 {offsets = [0, 24], sizes = [4, 8], strides = [1, 1]} : vector<4x32xbf16> to vector<4x8xbf16>
    %97 = vector.extract_strided_slice %40 {offsets = [0, 24], sizes = [4, 8], strides = [1, 1]} : vector<4x32xbf16> to vector<4x8xbf16>
    %cst_48 = arith.constant dense<0.000000e+00> : vector<4x4xf32>
    %98 = tpu.matmul %96, %97, %cst_48 {dimension_numbers = #tpu.dot_dimension_numbers<[1], [1], [0], [0], [0, 0, 1, 0], [], []>} : vector<4x8xbf16>, vector<4x8xbf16>, vector<4x4xf32> -> vector<4x4xf32>
    %99 = arith.addf %98, %10 : vector<4x4xf32>
    %cst_49 = arith.constant dense<0xFF800000> : vector<4xf32>
    %100 = vector.multi_reduction <maximumf>, %99, %cst_49 [1] : vector<4x4xf32> to vector<4xf32>
    %101 = vector.shape_cast %100 : vector<4xf32> to vector<4x1xf32>
    %102 = vector.broadcast %101 : vector<4x1xf32> to vector<4x4xf32>
    %103 = arith.subf %99, %102 : vector<4x4xf32>
    %104 = math.exp %103 : vector<4x4xf32>
    %cst_50 = arith.constant dense<0.000000e+00> : vector<4xf32>
    %105 = vector.multi_reduction <add>, %104, %cst_50 [1] : vector<4x4xf32> to vector<4xf32>
    %106 = vector.shape_cast %105 : vector<4xf32> to vector<4x1xf32>
    %107 = tpu.reciprocal %106 {approx = true} : vector<4x1xf32> -> vector<4x1xf32>
    %108 = vector.broadcast %107 : vector<4x1xf32> to vector<4x4xf32>
    %109 = arith.mulf %104, %108 : vector<4x4xf32>
    %110 = arith.truncf %109 : vector<4x4xf32> to vector<4x4xbf16>
    %111 = vector.extract_strided_slice %41 {offsets = [0, 24], sizes = [4, 8], strides = [1, 1]} : vector<4x32xbf16> to vector<4x8xbf16>
    %cst_51 = arith.constant dense<0.000000e+00> : vector<4x8xf32>
    %112 = tpu.matmul %110, %111, %cst_51 {dimension_numbers = #tpu.dot_dimension_numbers<[1], [0], [0], [1], [0, 0, 1, 1], [], []>} : vector<4x4xbf16>, vector<4x8xbf16>, vector<4x8xf32> -> vector<4x8xf32>
    %c0_52 = arith.constant 0 : index
    %c24 = arith.constant 24 : index
    %113 = vector.load %arg26[%c0_52, %c24] : memref<4x32xf32, #tpu.memory_space<vmem>>, vector<4x8xf32>
    tpu.vector_store %arg26[%c0_52, %c24], %112 {strides = array<i32>} : memref<4x32xf32, #tpu.memory_space<vmem>>, vector<4x8xf32>,
    %c0_53 = arith.constant 0 : index
    %c0_54 = arith.constant 0 : index
    %114 = vector.load %arg26[%c0_53, %c0_54] : memref<4x32xf32, #tpu.memory_space<vmem>>, vector<4x32xf32>
    %115 = arith.truncf %114 : vector<4x32xf32> to vector<4x32xbf16>
    %c0_55 = arith.constant 0 : index
    %c0_56 = arith.constant 0 : index
    %c0_57 = arith.constant 0 : index
    %116 = vector.load %arg10[%c0_55, %c0_56, %c0_57] : memref<1x32x32xbf16, #tpu.memory_space<vmem>>, vector<1x32x32xbf16>
    %117 = vector.shape_cast %116 : vector<1x32x32xbf16> to vector<32x32xbf16>
    %cst_58 = arith.constant dense<0.000000e+00> : vector<4x32xf32>
    %118 = tpu.matmul %115, %117, %cst_58 {dimension_numbers = #tpu.dot_dimension_numbers<[1], [0], [0], [1], [0, 0, 1, 1], [], []>} : vector<4x32xbf16>, vector<32x32xbf16>, vector<4x32xf32> -> vector<4x32xf32>
    %119 = arith.addf %19, %118 : vector<4x32xf32>
    %120 = vector.extract_strided_slice %23 {offsets = [0, 0], sizes = [1, 32], strides = [1, 1]} : vector<3x32xf32> to vector<1x32xf32>
    %121 = vector.broadcast %120 : vector<1x32xf32> to vector<4x32xf32>
    %122 = arith.addf %119, %121 : vector<4x32xf32>
    %123 = vector.extract_strided_slice %25 {offsets = [0, 0], sizes = [1, 32], strides = [1, 1]} : vector<3x32xf32> to vector<1x32xf32>
    %124 = vector.extract_strided_slice %27 {offsets = [0, 0], sizes = [1, 32], strides = [1, 1]} : vector<3x32xf32> to vector<1x32xf32>
    %cst_59 = arith.constant dense<0.000000e+00> : vector<4xf32>
    %125 = vector.multi_reduction <add>, %122, %cst_59 [1] : vector<4x32xf32> to vector<4xf32>
    %126 = vector.shape_cast %125 : vector<4xf32> to vector<4x1xf32>
    %cst_60 = arith.constant 3.200000e+01 : f32
    %127 = vector.broadcast %cst_60 : f32 to vector<4x1xf32>
    %128 = arith.divf %126, %127 : vector<4x1xf32>
    %129 = vector.broadcast %128 : vector<4x1xf32> to vector<4x32xf32>
    %130 = arith.subf %122, %129 : vector<4x32xf32>
    %131 = arith.mulf %130, %130 : vector<4x32xf32>
    %cst_61 = arith.constant dense<0.000000e+00> : vector<4xf32>
    %132 = vector.multi_reduction <add>, %131, %cst_61 [1] : vector<4x32xf32> to vector<4xf32>
    %133 = vector.shape_cast %132 : vector<4xf32> to vector<4x1xf32>
    %cst_62 = arith.constant 3.200000e+01 : f32
    %134 = vector.broadcast %cst_62 : f32 to vector<4x1xf32>
    %135 = arith.divf %133, %134 : vector<4x1xf32>
    %cst_63 = arith.constant 9.99999974E-6 : f32
    %136 = vector.broadcast %cst_63 : f32 to vector<4x1xf32>
    %137 = arith.addf %135, %136 : vector<4x1xf32>
    %138 = math.rsqrt %137 : vector<4x1xf32>
    %139 = vector.broadcast %138 : vector<4x1xf32> to vector<4x32xf32>
    %140 = arith.mulf %130, %139 : vector<4x32xf32>
    %141 = vector.broadcast %123 : vector<1x32xf32> to vector<4x32xf32>
    %142 = arith.mulf %140, %141 : vector<4x32xf32>
    %143 = vector.broadcast %124 : vector<1x32xf32> to vector<4x32xf32>
    %144 = arith.addf %142, %143 : vector<4x32xf32>
    %145 = arith.truncf %144 : vector<4x32xf32> to vector<4x32xbf16>
    %c0_64 = arith.constant 0 : index
    %c0_65 = arith.constant 0 : index
    %c0_66 = arith.constant 0 : index
    %146 = vector.load %arg11[%c0_64, %c0_65, %c0_66] : memref<1x32x32xbf16, #tpu.memory_space<vmem>>, vector<1x32x32xbf16>
    %147 = vector.shape_cast %146 : vector<1x32x32xbf16> to vector<32x32xbf16>
    %cst_67 = arith.constant dense<0.000000e+00> : vector<4x32xf32>
    %148 = tpu.matmul %145, %147, %cst_67 {dimension_numbers = #tpu.dot_dimension_numbers<[1], [0], [0], [1], [0, 0, 1, 1], [], []>} : vector<4x32xbf16>, vector<32x32xbf16>, vector<4x32xf32> -> vector<4x32xf32>
    %c0_68 = arith.constant 0 : index
    %c0_69 = arith.constant 0 : index
    %c0_70 = arith.constant 0 : index
    %149 = vector.load %arg12[%c0_68, %c0_69, %c0_70] : memref<1x1x32xf32, #tpu.memory_space<vmem>>, vector<1x1x32xf32>
    %150 = vector.shape_cast %149 : vector<1x1x32xf32> to vector<1x32xf32>
    %151 = vector.broadcast %150 : vector<1x32xf32> to vector<4x32xf32>
    %152 = arith.addf %148, %151 : vector<4x32xf32>
    %c0_71 = arith.constant 0 : index
    %c0_72 = arith.constant 0 : index
    %c0_73 = arith.constant 0 : index
    %153 = vector.load %arg13[%c0_71, %c0_72, %c0_73] : memref<1x32x64xbf16, #tpu.memory_space<vmem>>, vector<1x32x64xbf16>
    %154 = vector.shape_cast %153 : vector<1x32x64xbf16> to vector<32x64xbf16>
    %cst_74 = arith.constant dense<0.000000e+00> : vector<16x64xf32>
    %155 = tpu.matmul %21, %154, %cst_74 {dimension_numbers = #tpu.dot_dimension_numbers<[1], [0], [0], [1], [0, 0, 1, 1], [], []>} : vector<16x32xbf16>, vector<32x64xbf16>, vector<16x64xf32> -> vector<16x64xf32>
    %c0_75 = arith.constant 0 : index
    %c0_76 = arith.constant 0 : index
    %c0_77 = arith.constant 0 : index
    %156 = vector.load %arg14[%c0_75, %c0_76, %c0_77] : memref<1x1x64xf32, #tpu.memory_space<vmem>>, vector<1x1x64xf32>
    %157 = vector.shape_cast %156 : vector<1x1x64xf32> to vector<1x64xf32>
    %158 = vector.broadcast %157 : vector<1x64xf32> to vector<16x64xf32>
    %159 = arith.addf %155, %158 : vector<16x64xf32>
    %160 = vector.extract_strided_slice %159 {offsets = [0, 0], sizes = [16, 32], strides = [1, 1]} : vector<16x64xf32> to vector<16x32xf32>
    %161 = vector.extract_strided_slice %159 {offsets = [0, 32], sizes = [16, 32], strides = [1, 1]} : vector<16x64xf32> to vector<16x32xf32>
    %162 = arith.truncf %152 : vector<4x32xf32> to vector<4x32xbf16>
    %163 = arith.truncf %160 : vector<16x32xf32> to vector<16x32xbf16>
    %164 = arith.truncf %161 : vector<16x32xf32> to vector<16x32xbf16>
    %165 = vector.extract_strided_slice %162 {offsets = [0, 0], sizes = [4, 8], strides = [1, 1]} : vector<4x32xbf16> to vector<4x8xbf16>
    %166 = vector.extract_strided_slice %163 {offsets = [0, 0], sizes = [16, 8], strides = [1, 1]} : vector<16x32xbf16> to vector<16x8xbf16>
    %cst_78 = arith.constant dense<0.000000e+00> : vector<4x16xf32>
    %167 = tpu.matmul %165, %166, %cst_78 {dimension_numbers = #tpu.dot_dimension_numbers<[1], [1], [0], [0], [0, 0, 1, 0], [], []>} : vector<4x8xbf16>, vector<16x8xbf16>, vector<4x16xf32> -> vector<4x16xf32>
    %168 = arith.addf %167, %18 : vector<4x16xf32>
    %cst_79 = arith.constant dense<0xFF800000> : vector<4xf32>
    %169 = vector.multi_reduction <maximumf>, %168, %cst_79 [1] : vector<4x16xf32> to vector<4xf32>
    %170 = vector.shape_cast %169 : vector<4xf32> to vector<4x1xf32>
    %171 = vector.broadcast %170 : vector<4x1xf32> to vector<4x16xf32>
    %172 = arith.subf %168, %171 : vector<4x16xf32>
    %173 = math.exp %172 : vector<4x16xf32>
    %cst_80 = arith.constant dense<0.000000e+00> : vector<4xf32>
    %174 = vector.multi_reduction <add>, %173, %cst_80 [1] : vector<4x16xf32> to vector<4xf32>
    %175 = vector.shape_cast %174 : vector<4xf32> to vector<4x1xf32>
    %176 = tpu.reciprocal %175 {approx = true} : vector<4x1xf32> -> vector<4x1xf32>
    %177 = vector.broadcast %176 : vector<4x1xf32> to vector<4x16xf32>
    %178 = arith.mulf %173, %177 : vector<4x16xf32>
    %179 = arith.truncf %178 : vector<4x16xf32> to vector<4x16xbf16>
    %180 = vector.extract_strided_slice %164 {offsets = [0, 0], sizes = [16, 8], strides = [1, 1]} : vector<16x32xbf16> to vector<16x8xbf16>
    %cst_81 = arith.constant dense<0.000000e+00> : vector<4x8xf32>
    %181 = tpu.matmul %179, %180, %cst_81 {dimension_numbers = #tpu.dot_dimension_numbers<[1], [0], [0], [1], [0, 0, 1, 1], [], []>} : vector<4x16xbf16>, vector<16x8xbf16>, vector<4x8xf32> -> vector<4x8xf32>
    %c0_82 = arith.constant 0 : index
    %c0_83 = arith.constant 0 : index
    %182 = vector.load %arg26[%c0_82, %c0_83] : memref<4x32xf32, #tpu.memory_space<vmem>>, vector<4x8xf32>
    tpu.vector_store %arg26[%c0_82, %c0_83], %181 {strides = array<i32>} : memref<4x32xf32, #tpu.memory_space<vmem>>, vector<4x8xf32>,
    %183 = vector.extract_strided_slice %162 {offsets = [0, 8], sizes = [4, 8], strides = [1, 1]} : vector<4x32xbf16> to vector<4x8xbf16>
    %184 = vector.extract_strided_slice %163 {offsets = [0, 8], sizes = [16, 8], strides = [1, 1]} : vector<16x32xbf16> to vector<16x8xbf16>
    %cst_84 = arith.constant dense<0.000000e+00> : vector<4x16xf32>
    %185 = tpu.matmul %183, %184, %cst_84 {dimension_numbers = #tpu.dot_dimension_numbers<[1], [1], [0], [0], [0, 0, 1, 0], [], []>} : vector<4x8xbf16>, vector<16x8xbf16>, vector<4x16xf32> -> vector<4x16xf32>
    %186 = arith.addf %185, %18 : vector<4x16xf32>
    %cst_85 = arith.constant dense<0xFF800000> : vector<4xf32>
    %187 = vector.multi_reduction <maximumf>, %186, %cst_85 [1] : vector<4x16xf32> to vector<4xf32>
    %188 = vector.shape_cast %187 : vector<4xf32> to vector<4x1xf32>
    %189 = vector.broadcast %188 : vector<4x1xf32> to vector<4x16xf32>
    %190 = arith.subf %186, %189 : vector<4x16xf32>
    %191 = math.exp %190 : vector<4x16xf32>
    %cst_86 = arith.constant dense<0.000000e+00> : vector<4xf32>
    %192 = vector.multi_reduction <add>, %191, %cst_86 [1] : vector<4x16xf32> to vector<4xf32>
    %193 = vector.shape_cast %192 : vector<4xf32> to vector<4x1xf32>
    %194 = tpu.reciprocal %193 {approx = true} : vector<4x1xf32> -> vector<4x1xf32>
    %195 = vector.broadcast %194 : vector<4x1xf32> to vector<4x16xf32>
    %196 = arith.mulf %191, %195 : vector<4x16xf32>
    %197 = arith.truncf %196 : vector<4x16xf32> to vector<4x16xbf16>
    %198 = vector.extract_strided_slice %164 {offsets = [0, 8], sizes = [16, 8], strides = [1, 1]} : vector<16x32xbf16> to vector<16x8xbf16>
    %cst_87 = arith.constant dense<0.000000e+00> : vector<4x8xf32>
    %199 = tpu.matmul %197, %198, %cst_87 {dimension_numbers = #tpu.dot_dimension_numbers<[1], [0], [0], [1], [0, 0, 1, 1], [], []>} : vector<4x16xbf16>, vector<16x8xbf16>, vector<4x8xf32> -> vector<4x8xf32>
    %c0_88 = arith.constant 0 : index
    %c8_89 = arith.constant 8 : index
    %200 = vector.load %arg26[%c0_88, %c8_89] : memref<4x32xf32, #tpu.memory_space<vmem>>, vector<4x8xf32>
    tpu.vector_store %arg26[%c0_88, %c8_89], %199 {strides = array<i32>} : memref<4x32xf32, #tpu.memory_space<vmem>>, vector<4x8xf32>,
    %201 = vector.extract_strided_slice %162 {offsets = [0, 16], sizes = [4, 8], strides = [1, 1]} : vector<4x32xbf16> to vector<4x8xbf16>
    %202 = vector.extract_strided_slice %163 {offsets = [0, 16], sizes = [16, 8], strides = [1, 1]} : vector<16x32xbf16> to vector<16x8xbf16>
    %cst_90 = arith.constant dense<0.000000e+00> : vector<4x16xf32>
    %203 = tpu.matmul %201, %202, %cst_90 {dimension_numbers = #tpu.dot_dimension_numbers<[1], [1], [0], [0], [0, 0, 1, 0], [], []>} : vector<4x8xbf16>, vector<16x8xbf16>, vector<4x16xf32> -> vector<4x16xf32>
    %204 = arith.addf %203, %18 : vector<4x16xf32>
    %cst_91 = arith.constant dense<0xFF800000> : vector<4xf32>
    %205 = vector.multi_reduction <maximumf>, %204, %cst_91 [1] : vector<4x16xf32> to vector<4xf32>
    %206 = vector.shape_cast %205 : vector<4xf32> to vector<4x1xf32>
    %207 = vector.broadcast %206 : vector<4x1xf32> to vector<4x16xf32>
    %208 = arith.subf %204, %207 : vector<4x16xf32>
    %209 = math.exp %208 : vector<4x16xf32>
    %cst_92 = arith.constant dense<0.000000e+00> : vector<4xf32>
    %210 = vector.multi_reduction <add>, %209, %cst_92 [1] : vector<4x16xf32> to vector<4xf32>
    %211 = vector.shape_cast %210 : vector<4xf32> to vector<4x1xf32>
    %212 = tpu.reciprocal %211 {approx = true} : vector<4x1xf32> -> vector<4x1xf32>
    %213 = vector.broadcast %212 : vector<4x1xf32> to vector<4x16xf32>
    %214 = arith.mulf %209, %213 : vector<4x16xf32>
    %215 = arith.truncf %214 : vector<4x16xf32> to vector<4x16xbf16>
    %216 = vector.extract_strided_slice %164 {offsets = [0, 16], sizes = [16, 8], strides = [1, 1]} : vector<16x32xbf16> to vector<16x8xbf16>
    %cst_93 = arith.constant dense<0.000000e+00> : vector<4x8xf32>
    %217 = tpu.matmul %215, %216, %cst_93 {dimension_numbers = #tpu.dot_dimension_numbers<[1], [0], [0], [1], [0, 0, 1, 1], [], []>} : vector<4x16xbf16>, vector<16x8xbf16>, vector<4x8xf32> -> vector<4x8xf32>
    %c0_94 = arith.constant 0 : index
    %c16_95 = arith.constant 16 : index
    %218 = vector.load %arg26[%c0_94, %c16_95] : memref<4x32xf32, #tpu.memory_space<vmem>>, vector<4x8xf32>
    tpu.vector_store %arg26[%c0_94, %c16_95], %217 {strides = array<i32>} : memref<4x32xf32, #tpu.memory_space<vmem>>, vector<4x8xf32>,
    %219 = vector.extract_strided_slice %162 {offsets = [0, 24], sizes = [4, 8], strides = [1, 1]} : vector<4x32xbf16> to vector<4x8xbf16>
    %220 = vector.extract_strided_slice %163 {offsets = [0, 24], sizes = [16, 8], strides = [1, 1]} : vector<16x32xbf16> to vector<16x8xbf16>
    %cst_96 = arith.constant dense<0.000000e+00> : vector<4x16xf32>
    %221 = tpu.matmul %219, %220, %cst_96 {dimension_numbers = #tpu.dot_dimension_numbers<[1], [1], [0], [0], [0, 0, 1, 0], [], []>} : vector<4x8xbf16>, vector<16x8xbf16>, vector<4x16xf32> -> vector<4x16xf32>
    %222 = arith.addf %221, %18 : vector<4x16xf32>
    %cst_97 = arith.constant dense<0xFF800000> : vector<4xf32>
    %223 = vector.multi_reduction <maximumf>, %222, %cst_97 [1] : vector<4x16xf32> to vector<4xf32>
    %224 = vector.shape_cast %223 : vector<4xf32> to vector<4x1xf32>
    %225 = vector.broadcast %224 : vector<4x1xf32> to vector<4x16xf32>
    %226 = arith.subf %222, %225 : vector<4x16xf32>
    %227 = math.exp %226 : vector<4x16xf32>
    %cst_98 = arith.constant dense<0.000000e+00> : vector<4xf32>
    %228 = vector.multi_reduction <add>, %227, %cst_98 [1] : vector<4x16xf32> to vector<4xf32>
    %229 = vector.shape_cast %228 : vector<4xf32> to vector<4x1xf32>
    %230 = tpu.reciprocal %229 {approx = true} : vector<4x1xf32> -> vector<4x1xf32>
    %231 = vector.broadcast %230 : vector<4x1xf32> to vector<4x16xf32>
    %232 = arith.mulf %227, %231 : vector<4x16xf32>
    %233 = arith.truncf %232 : vector<4x16xf32> to vector<4x16xbf16>
    %234 = vector.extract_strided_slice %164 {offsets = [0, 24], sizes = [16, 8], strides = [1, 1]} : vector<16x32xbf16> to vector<16x8xbf16>
    %cst_99 = arith.constant dense<0.000000e+00> : vector<4x8xf32>
    %235 = tpu.matmul %233, %234, %cst_99 {dimension_numbers = #tpu.dot_dimension_numbers<[1], [0], [0], [1], [0, 0, 1, 1], [], []>} : vector<4x16xbf16>, vector<16x8xbf16>, vector<4x8xf32> -> vector<4x8xf32>
    %c0_100 = arith.constant 0 : index
    %c24_101 = arith.constant 24 : index
    %236 = vector.load %arg26[%c0_100, %c24_101] : memref<4x32xf32, #tpu.memory_space<vmem>>, vector<4x8xf32>
    tpu.vector_store %arg26[%c0_100, %c24_101], %235 {strides = array<i32>} : memref<4x32xf32, #tpu.memory_space<vmem>>, vector<4x8xf32>,
    %c0_102 = arith.constant 0 : index
    %c0_103 = arith.constant 0 : index
    %237 = vector.load %arg26[%c0_102, %c0_103] : memref<4x32xf32, #tpu.memory_space<vmem>>, vector<4x32xf32>
    %238 = arith.truncf %237 : vector<4x32xf32> to vector<4x32xbf16>
    %c0_104 = arith.constant 0 : index
    %c0_105 = arith.constant 0 : index
    %c0_106 = arith.constant 0 : index
    %239 = vector.load %arg15[%c0_104, %c0_105, %c0_106] : memref<1x32x32xbf16, #tpu.memory_space<vmem>>, vector<1x32x32xbf16>
    %240 = vector.shape_cast %239 : vector<1x32x32xbf16> to vector<32x32xbf16>
    %cst_107 = arith.constant dense<0.000000e+00> : vector<4x32xf32>
    %241 = tpu.matmul %238, %240, %cst_107 {dimension_numbers = #tpu.dot_dimension_numbers<[1], [0], [0], [1], [0, 0, 1, 1], [], []>} : vector<4x32xbf16>, vector<32x32xbf16>, vector<4x32xf32> -> vector<4x32xf32>
    %242 = arith.addf %144, %241 : vector<4x32xf32>
    %243 = vector.extract_strided_slice %23 {offsets = [1, 0], sizes = [1, 32], strides = [1, 1]} : vector<3x32xf32> to vector<1x32xf32>
    %244 = vector.broadcast %243 : vector<1x32xf32> to vector<4x32xf32>
    %245 = arith.addf %242, %244 : vector<4x32xf32>
    %246 = vector.extract_strided_slice %25 {offsets = [1, 0], sizes = [1, 32], strides = [1, 1]} : vector<3x32xf32> to vector<1x32xf32>
    %247 = vector.extract_strided_slice %27 {offsets = [1, 0], sizes = [1, 32], strides = [1, 1]} : vector<3x32xf32> to vector<1x32xf32>
    %cst_108 = arith.constant dense<0.000000e+00> : vector<4xf32>
    %248 = vector.multi_reduction <add>, %245, %cst_108 [1] : vector<4x32xf32> to vector<4xf32>
    %249 = vector.shape_cast %248 : vector<4xf32> to vector<4x1xf32>
    %cst_109 = arith.constant 3.200000e+01 : f32
    %250 = vector.broadcast %cst_109 : f32 to vector<4x1xf32>
    %251 = arith.divf %249, %250 : vector<4x1xf32>
    %252 = vector.broadcast %251 : vector<4x1xf32> to vector<4x32xf32>
    %253 = arith.subf %245, %252 : vector<4x32xf32>
    %254 = arith.mulf %253, %253 : vector<4x32xf32>
    %cst_110 = arith.constant dense<0.000000e+00> : vector<4xf32>
    %255 = vector.multi_reduction <add>, %254, %cst_110 [1] : vector<4x32xf32> to vector<4xf32>
    %256 = vector.shape_cast %255 : vector<4xf32> to vector<4x1xf32>
    %cst_111 = arith.constant 3.200000e+01 : f32
    %257 = vector.broadcast %cst_111 : f32 to vector<4x1xf32>
    %258 = arith.divf %256, %257 : vector<4x1xf32>
    %cst_112 = arith.constant 9.99999974E-6 : f32
    %259 = vector.broadcast %cst_112 : f32 to vector<4x1xf32>
    %260 = arith.addf %258, %259 : vector<4x1xf32>
    %261 = math.rsqrt %260 : vector<4x1xf32>
    %262 = vector.broadcast %261 : vector<4x1xf32> to vector<4x32xf32>
    %263 = arith.mulf %253, %262 : vector<4x32xf32>
    %264 = vector.broadcast %246 : vector<1x32xf32> to vector<4x32xf32>
    %265 = arith.mulf %263, %264 : vector<4x32xf32>
    %266 = vector.broadcast %247 : vector<1x32xf32> to vector<4x32xf32>
    %267 = arith.addf %265, %266 : vector<4x32xf32>
    %268 = arith.truncf %267 : vector<4x32xf32> to vector<4x32xbf16>
    %c0_113 = arith.constant 0 : index
    %c0_114 = arith.constant 0 : index
    %c0_115 = arith.constant 0 : index
    %269 = vector.load %arg16[%c0_113, %c0_114, %c0_115] : memref<1x32x2048xbf16, #tpu.memory_space<vmem>>, vector<1x32x2048xbf16>
    %270 = vector.shape_cast %269 : vector<1x32x2048xbf16> to vector<32x2048xbf16>
    %cst_116 = arith.constant dense<0.000000e+00> : vector<4x2048xf32>
    %271 = tpu.matmul %268, %270, %cst_116 {dimension_numbers = #tpu.dot_dimension_numbers<[1], [0], [0], [1], [0, 0, 1, 1], [], []>} : vector<4x32xbf16>, vector<32x2048xbf16>, vector<4x2048xf32> -> vector<4x2048xf32>
    %c0_117 = arith.constant 0 : index
    %c0_118 = arith.constant 0 : index
    %c0_119 = arith.constant 0 : index
    %272 = vector.load %arg17[%c0_117, %c0_118, %c0_119] : memref<1x1x2048xf32, #tpu.memory_space<vmem>>, vector<1x1x2048xf32>
    %273 = vector.shape_cast %272 : vector<1x1x2048xf32> to vector<1x2048xf32>
    %274 = vector.broadcast %273 : vector<1x2048xf32> to vector<4x2048xf32>
    %275 = arith.addf %271, %274 : vector<4x2048xf32>
    %cst_120 = arith.constant 0.000000e+00 : f32
    %276 = vector.broadcast %cst_120 : f32 to vector<4x2048xf32>
    %277 = arith.maximumf %275, %276 : vector<4x2048xf32>
    %278 = arith.truncf %277 : vector<4x2048xf32> to vector<4x2048xbf16>
    %c0_121 = arith.constant 0 : index
    %c0_122 = arith.constant 0 : index
    %c0_123 = arith.constant 0 : index
    %279 = vector.load %arg18[%c0_121, %c0_122, %c0_123] : memref<1x32x2048xbf16, #tpu.memory_space<vmem>>, vector<1x32x2048xbf16>
    %280 = vector.shape_cast %279 : vector<1x32x2048xbf16> to vector<32x2048xbf16>
    %cst_124 = arith.constant dense<0.000000e+00> : vector<4x32xf32>
    %281 = tpu.matmul %278, %280, %cst_124 {dimension_numbers = #tpu.dot_dimension_numbers<[1], [1], [0], [0], [0, 0, 1, 0], [], []>} : vector<4x2048xbf16>, vector<32x2048xbf16>, vector<4x32xf32> -> vector<4x32xf32>
    %282 = arith.addf %267, %281 : vector<4x32xf32>
    %283 = vector.extract_strided_slice %23 {offsets = [2, 0], sizes = [1, 32], strides = [1, 1]} : vector<3x32xf32> to vector<1x32xf32>
    %284 = vector.broadcast %283 : vector<1x32xf32> to vector<4x32xf32>
    %285 = arith.addf %282, %284 : vector<4x32xf32>
    %286 = vector.extract_strided_slice %25 {offsets = [2, 0], sizes = [1, 32], strides = [1, 1]} : vector<3x32xf32> to vector<1x32xf32>
    %287 = vector.extract_strided_slice %27 {offsets = [2, 0], sizes = [1, 32], strides = [1, 1]} : vector<3x32xf32> to vector<1x32xf32>
    %cst_125 = arith.constant dense<0.000000e+00> : vector<4xf32>
    %288 = vector.multi_reduction <add>, %285, %cst_125 [1] : vector<4x32xf32> to vector<4xf32>
    %289 = vector.shape_cast %288 : vector<4xf32> to vector<4x1xf32>
    %cst_126 = arith.constant 3.200000e+01 : f32
    %290 = vector.broadcast %cst_126 : f32 to vector<4x1xf32>
    %291 = arith.divf %289, %290 : vector<4x1xf32>
    %292 = vector.broadcast %291 : vector<4x1xf32> to vector<4x32xf32>
    %293 = arith.subf %285, %292 : vector<4x32xf32>
    %294 = arith.mulf %293, %293 : vector<4x32xf32>
    %cst_127 = arith.constant dense<0.000000e+00> : vector<4xf32>
    %295 = vector.multi_reduction <add>, %294, %cst_127 [1] : vector<4x32xf32> to vector<4xf32>
    %296 = vector.shape_cast %295 : vector<4xf32> to vector<4x1xf32>
    %cst_128 = arith.constant 3.200000e+01 : f32
    %297 = vector.broadcast %cst_128 : f32 to vector<4x1xf32>
    %298 = arith.divf %296, %297 : vector<4x1xf32>
    %cst_129 = arith.constant 9.99999974E-6 : f32
    %299 = vector.broadcast %cst_129 : f32 to vector<4x1xf32>
    %300 = arith.addf %298, %299 : vector<4x1xf32>
    %301 = math.rsqrt %300 : vector<4x1xf32>
    %302 = vector.broadcast %301 : vector<4x1xf32> to vector<4x32xf32>
    %303 = arith.mulf %293, %302 : vector<4x32xf32>
    %304 = vector.broadcast %286 : vector<1x32xf32> to vector<4x32xf32>
    %305 = arith.mulf %303, %304 : vector<4x32xf32>
    %306 = vector.broadcast %287 : vector<1x32xf32> to vector<4x32xf32>
    %307 = arith.addf %305, %306 : vector<4x32xf32>
    %c0_130 = arith.constant 0 : index
    %c0_131 = arith.constant 0 : index
    %308 = vector.load %arg25[%c0_130, %c0_131] : memref<4x32xf32, #tpu.memory_space<vmem>>, vector<4x32xf32>
    tpu.vector_store %arg25[%c0_130, %c0_131], %307 {strides = array<i32>} : memref<4x32xf32, #tpu.memory_space<vmem>>, vector<4x32xf32>,
    %c1_i32 = arith.constant 1 : i32
    %309 = arith.cmpi eq, %arg1, %c1_i32 : i32
    %310 = arith.extui %309 : i1 to i32
    %c0_i32_132 = arith.constant 0 : i32
    %311 = arith.cmpi ne, %310, %c0_i32_132 : i32
    scf.if %311 {
      %c0_133 = arith.constant 0 : index
      %c0_134 = arith.constant 0 : index
      %312 = vector.load %arg7[%c0_133, %c0_134] : memref<1x1xf32, #tpu.memory_space<vmem>>, vector<1x1xf32>
      %c0_135 = arith.constant 0 : index
      %c0_136 = arith.constant 0 : index
      %313 = vector.load %arg5[%c0_135, %c0_136] : memref<1x4xf32, #tpu.memory_space<vmem>>, vector<1x4xf32>
      %314 = vector.broadcast %312 : vector<1x1xf32> to vector<1x4xf32>
      %315 = arith.cmpf oeq, %314, %313 : vector<1x4xf32>
      %cst_137 = arith.constant 2.500000e-01 : f32
      %cst_138 = arith.constant 0.000000e+00 : f32
      %316 = vector.broadcast %cst_137 : f32 to vector<1x4xf32>
      %317 = vector.broadcast %cst_138 : f32 to vector<1x4xf32>
      %318 = arith.select %315, %316, %317 : vector<1x4xi1>, vector<1x4xf32>
      %cst_139 = arith.constant dense<0.000000e+00> : vector<1x32xf32>
      %319 = tpu.matmul %318, %307, %cst_139 {dimension_numbers = #tpu.dot_dimension_numbers<[1], [0], [0], [1], [0, 0, 1, 1], [], []>} : vector<1x4xf32>, vector<4x32xf32>, vector<1x32xf32> -> vector<1x32xf32>
      %c0_140 = arith.constant 0 : index
      %c0_141 = arith.constant 0 : index
      %320 = vector.load %arg22[%c0_140, %c0_141] : memref<32x8xf32, #tpu.memory_space<vmem>>, vector<32x8xf32>
      %cst_142 = arith.constant dense<0.000000e+00> : vector<1x8xf32>
      %321 = tpu.matmul %319, %320, %cst_142 {dimension_numbers = #tpu.dot_dimension_numbers<[1], [0], [0], [1], [0, 0, 1, 1], [], []>} : vector<1x32xf32>, vector<32x8xf32>, vector<1x8xf32> -> vector<1x8xf32>
      %c0_143 = arith.constant 0 : index
      %c0_144 = arith.constant 0 : index
      %322 = vector.load %arg23[%c0_143, %c0_144] : memref<1x8xf32, #tpu.memory_space<vmem>>, vector<1x8xf32>
      %323 = arith.addf %321, %322 : vector<1x8xf32>
      %c0_145 = arith.constant 0 : index
      %c0_146 = arith.constant 0 : index
      %c0_147 = arith.constant 0 : index
      %324 = vector.load %arg24[%c0_145, %c0_146, %c0_147] : memref<1x1x8xf32, #tpu.memory_space<vmem>>, vector<1x1x8xf32>
      %325 = vector.shape_cast %324 : vector<1x1x8xf32> to vector<1x8xf32>
      %326 = vector.shape_cast %323 : vector<1x8xf32> to vector<1x1x8xf32>
      tpu.vector_store %arg24[%c0_145, %c0_146, %c0_147], %326 {strides = array<i32>} : memref<1x1x8xf32, #tpu.memory_space<vmem>>, vector<1x1x8xf32>,
    } else {
    }
    return
  }
  func.func @transform_0(%arg0: i32, %arg1: i32) -> (i32, i32) {
    %c0_i32 = arith.constant 0 : i32
    %c0_i32_0 = arith.constant 0 : i32
    %c0_i32_1 = arith.constant 0 : i32
    return %c0_i32, %c0_i32_0 : i32, i32
  }
  func.func @transform_1(%arg0: i32, %arg1: i32) -> (i32, i32, i32) {
    %c0_i32 = arith.constant 0 : i32
    %c0_i32_0 = arith.constant 0 : i32
    %c0_i32_1 = arith.constant 0 : i32
    return %arg0, %c0_i32, %c0_i32_0 : i32, i32, i32
  }
  func.func @transform_2(%arg0: i32, %arg1: i32) -> (i32, i32) {
    %c0_i32 = arith.constant 0 : i32
    %c0_i32_0 = arith.constant 0 : i32
    %c0_i32_1 = arith.constant 0 : i32
    return %c0_i32, %c0_i32_0 : i32, i32
  }
  func.func @transform_3(%arg0: i32, %arg1: i32) -> (i32, i32) {
    %c0_i32 = arith.constant 0 : i32
    %c0_i32_0 = arith.constant 0 : i32
    %c0_i32_1 = arith.constant 0 : i32
    return %c0_i32, %c0_i32_0 : i32, i32
  }
  func.func @transform_4(%arg0: i32, %arg1: i32) -> (i32, i32) {
    %c0_i32 = arith.constant 0 : i32
    %c0_i32_0 = arith.constant 0 : i32
    %c0_i32_1 = arith.constant 0 : i32
    return %c0_i32, %c0_i32_0 : i32, i32
  }
  func.func @transform_5(%arg0: i32, %arg1: i32) -> (i32, i32) {
    %c0_i32 = arith.constant 0 : i32
    %c0_i32_0 = arith.constant 0 : i32
    %c0_i32_1 = arith.constant 0 : i32
    return %c0_i32, %c0_i32_0 : i32, i32
  }
  func.func @transform_6(%arg0: i32, %arg1: i32) -> (i32, i32, i32) {
    %c0_i32 = arith.constant 0 : i32
    %c0_i32_0 = arith.constant 0 : i32
    %c0_i32_1 = arith.constant 0 : i32
    return %arg1, %c0_i32, %c0_i32_0 : i32, i32, i32
  }
  func.func @transform_7(%arg0: i32, %arg1: i32) -> (i32, i32, i32) {
    %c0_i32 = arith.constant 0 : i32
    %c0_i32_0 = arith.constant 0 : i32
    %c0_i32_1 = arith.constant 0 : i32
    return %arg1, %c0_i32, %c0_i32_0 : i32, i32, i32
  }
  func.func @transform_8(%arg0: i32, %arg1: i32) -> (i32, i32, i32) {
    %c0_i32 = arith.constant 0 : i32
    %c0_i32_0 = arith.constant 0 : i32
    %c0_i32_1 = arith.constant 0 : i32
    return %arg1, %c0_i32, %c0_i32_0 : i32, i32, i32
  }
  func.func @transform_9(%arg0: i32, %arg1: i32) -> (i32, i32, i32) {
    %c0_i32 = arith.constant 0 : i32
    %c0_i32_0 = arith.constant 0 : i32
    %c0_i32_1 = arith.constant 0 : i32
    return %arg1, %c0_i32, %c0_i32_0 : i32, i32, i32
  }
  func.func @transform_10(%arg0: i32, %arg1: i32) -> (i32, i32, i32) {
    %c0_i32 = arith.constant 0 : i32
    %c0_i32_0 = arith.constant 0 : i32
    %c0_i32_1 = arith.constant 0 : i32
    return %arg1, %c0_i32, %c0_i32_0 : i32, i32, i32
  }
  func.func @transform_11(%arg0: i32, %arg1: i32) -> (i32, i32, i32) {
    %c0_i32 = arith.constant 0 : i32
    %c0_i32_0 = arith.constant 0 : i32
    %c0_i32_1 = arith.constant 0 : i32
    return %arg1, %c0_i32, %c0_i32_0 : i32, i32, i32
  }
  func.func @transform_12(%arg0: i32, %arg1: i32) -> (i32, i32, i32) {
    %c0_i32 = arith.constant 0 : i32
    %c0_i32_0 = arith.constant 0 : i32
    %c0_i32_1 = arith.constant 0 : i32
    return %arg1, %c0_i32, %c0_i32_0 : i32, i32, i32
  }
  func.func @transform_13(%arg0: i32, %arg1: i32) -> (i32, i32, i32) {
    %c0_i32 = arith.constant 0 : i32
    %c0_i32_0 = arith.constant 0 : i32
    %c0_i32_1 = arith.constant 0 : i32
    return %arg1, %c0_i32, %c0_i32_0 : i32, i32, i32
  }
  func.func @transform_14(%arg0: i32, %arg1: i32) -> (i32, i32, i32) {
    %c0_i32 = arith.constant 0 : i32
    %c0_i32_0 = arith.constant 0 : i32
    %c0_i32_1 = arith.constant 0 : i32
    return %arg1, %c0_i32, %c0_i32_0 : i32, i32, i32
  }
  func.func @transform_15(%arg0: i32, %arg1: i32) -> (i32, i32, i32) {
    %c0_i32 = arith.constant 0 : i32
    %c0_i32_0 = arith.constant 0 : i32
    %c0_i32_1 = arith.constant 0 : i32
    return %arg1, %c0_i32, %c0_i32_0 : i32, i32, i32
  }
  func.func @transform_16(%arg0: i32, %arg1: i32) -> (i32, i32, i32) {
    %c0_i32 = arith.constant 0 : i32
    %c0_i32_0 = arith.constant 0 : i32
    %c0_i32_1 = arith.constant 0 : i32
    return %arg1, %c0_i32, %c0_i32_0 : i32, i32, i32
  }
  func.func @transform_17(%arg0: i32, %arg1: i32) -> (i32, i32, i32) {
    %c0_i32 = arith.constant 0 : i32
    %c0_i32_0 = arith.constant 0 : i32
    %c0_i32_1 = arith.constant 0 : i32
    return %arg1, %c0_i32, %c0_i32_0 : i32, i32, i32
  }
  func.func @transform_18(%arg0: i32, %arg1: i32) -> (i32, i32, i32) {
    %c0_i32 = arith.constant 0 : i32
    %c0_i32_0 = arith.constant 0 : i32
    %c0_i32_1 = arith.constant 0 : i32
    return %arg1, %c0_i32, %c0_i32_0 : i32, i32, i32
  }
  func.func @transform_19(%arg0: i32, %arg1: i32) -> (i32, i32, i32) {
    %c0_i32 = arith.constant 0 : i32
    %c0_i32_0 = arith.constant 0 : i32
    %c0_i32_1 = arith.constant 0 : i32
    return %arg1, %c0_i32, %c0_i32_0 : i32, i32, i32
  }
  func.func @transform_20(%arg0: i32, %arg1: i32) -> (i32, i32) {
    %c0_i32 = arith.constant 0 : i32
    %c0_i32_0 = arith.constant 0 : i32
    %c0_i32_1 = arith.constant 0 : i32
    return %c0_i32, %c0_i32_0 : i32, i32
  }
  func.func @transform_21(%arg0: i32, %arg1: i32) -> (i32, i32) {
    %c0_i32 = arith.constant 0 : i32
    %c0_i32_0 = arith.constant 0 : i32
    %c0_i32_1 = arith.constant 0 : i32
    return %c0_i32, %c0_i32_0 : i32, i32
  }
  func.func @transform_22(%arg0: i32, %arg1: i32) -> (i32, i32, i32) {
    %c0_i32 = arith.constant 0 : i32
    %c0_i32_0 = arith.constant 0 : i32
    %c0_i32_1 = arith.constant 0 : i32
    return %arg0, %c0_i32, %c0_i32_0 : i32, i32, i32
  }
}

</mosaic_0001>

<bundles_post_ra>
// kernel: tpu_custom_call.1
= control target key start
LH: loop header
LB: loop body
LE: loop exit
PB: predicated region body
PF: predicated region fallthrough
CT: control target
= control target key end

     0   :  { %s5052_s0 = inlined_call_operand.vmem [shape: f32[4,32], index: 0, kind: input, shape index: {}]   ;;  %s5053_s1 = inlined_call_operand.vmem [shape: bf16[2,16,32], index: 1, kind: input, shape index: {}]   ;;  %s5054_s2 = inlined_call_operand.vmem [shape: f32[4,1], index: 2, kind: input, shape index: {}]   ;;  %s5055_s3 = inlined_call_operand.vmem [shape: f32[1,4], index: 3, kind: input, shape index: {}]   ;;  %s5056_s4 = inlined_call_operand.vmem [shape: f32[1,16], index: 4, kind: input, shape index: {}]   ;;  %s5057_s5 = inlined_call_operand.<no memory space> [shape: f32[1,1], index: 5, kind: input, shape index: {}]   ;;  %s5058_s6 = inlined_call_operand.vmem [shape: bf16[2,32,96], index: 6, kind: input, shape index: {}]   ;;  %s5059_s7 = inlined_call_operand.vmem [shape: f32[2,1,96], index: 7, kind: input, shape index: {}]   ;;  %s5060_s8 = inlined_call_operand.hbm [shape: bf16[2,32,32], index: 8, kind: input, shape index: {}]   ;;  %s5061_s9 = inlined_call_operand.hbm [shape: bf16[2,32,32], index: 9, kind: input, shape index: {}]   ;;  %s5062_s10 = inlined_call_operand.vmem [shape: f32[2,1,32], index: 10, kind: input, shape index: {}]   ;;  %s5063_s11 = inlined_call_operand.hbm [shape: bf16[2,32,64], index: 11, kind: input, shape index: {}]   ;;  %s5064_s12 = inlined_call_operand.vmem [shape: f32[2,1,64], index: 12, kind: input, shape index: {}]   ;;  %s5065_s13 = inlined_call_operand.hbm [shape: bf16[2,32,32], index: 13, kind: input, shape index: {}]   ;;  %s5066_s14 = inlined_call_operand.hbm [shape: bf16[2,32,2048], index: 14, kind: input, shape index: {}]   ;;  %s5067_s15 = inlined_call_operand.hbm [shape: f32[2,1,2048], index: 15, kind: input, shape index: {}]   ;;  %s5068_s16 = inlined_call_operand.hbm [shape: bf16[2,32,2048], index: 16, kind: input, shape index: {}]   ;;  %s5069_s17 = inlined_call_operand.vmem [shape: f32[2,3,32], index: 17, kind: input, shape index: {}]   ;;  %s5070_s18 = inlined_call_operand.vmem [shape: f32[2,3,32], index: 18, kind: input, shape index: {}]   ;;  %s5071_s19 = inlined_call_operand.vmem [shape: f32[2,3,32], index: 19, kind: input, shape index: {}]   ;;  %s5072_s20 = inlined_call_operand.vmem [shape: f32[32,8], index: 20, kind: input, shape index: {}]   ;;  %s5073_s21 = inlined_call_operand.vmem [shape: f32[1,8], index: 21, kind: input, shape index: {}]   ;;  %s5074_s22 = inlined_call_operand.hbm [shape: f32[2,1,8], index: 22, kind: output, shape index: {}]  }
   0x1   :  { %5092 = sst [smem:[#allocation36_spill]] %s5052_s0 }
   0x2   :  { %5093 = sst [smem:[#allocation37_spill]] %s5053_s1 }
   0x3   :  { %5094 = sst [smem:[#allocation38_spill]] %s5054_s2 }
   0x4   :  { %5095 = sst [smem:[#allocation39_spill]] %s5055_s3 }
   0x5   :  { %5096 = sst [smem:[#allocation40_spill]] %s5056_s4 }
   0x6   :  { %5097 = sst [smem:[#allocation41_spill]] %s5057_s5 }
   0x7   :  { %5098 = sst [smem:[#allocation42_spill]] %s5058_s6 }
   0x8   :  { %5099 = sst [smem:[#allocation43_spill]] %s5059_s7 }
   0x9   :  { %5100 = sst [smem:[#allocation44_spill]] %s5060_s8 }
   0xa   :  { %5101 = sst [smem:[#allocation45_spill]] %s5061_s9 }
   0xb   :  { %5102 = sst [smem:[#allocation46_spill]] %s5062_s10 }
   0xc   :  { %5103 = sst [smem:[#allocation47_spill]] %s5063_s11 }
   0xd   :  { %5104 = sst [smem:[#allocation48_spill]] %s5064_s12 }
   0xe   :  { %5105 = sst [smem:[#allocation49_spill]] %s5065_s13 }
   0xf   :  { %5106 = sst [smem:[#allocation50_spill]] %s5066_s14 }
  0x10   :  { %5107 = sst [smem:[#allocation51_spill]] %s5067_s15 }
  0x11   :  { %5108 = sst [smem:[#allocation52_spill]] %s5068_s16 }
  0x12   :  { %5109 = sst [smem:[#allocation53_spill]] %s5069_s17 }
  0x13   :  { %5110 = sst [smem:[#allocation54_spill]] %s5070_s18 }
  0x14   :  { %5111 = sst [smem:[#allocation55_spill]] %s5071_s19 }
  0x15   :  { %5112 = sst [smem:[#allocation56_spill]] %s5072_s20 }
  0x16   :  { %5113 = sst [smem:[#allocation57_spill]] %s5073_s21 }
  0x17   :  { %5114 = sst [smem:[#allocation58_spill]] %s5074_s22 }
  0x18   :  { %s5115_s29 = sld [smem:[#allocation41_spill]] }
  0x1e   :  { %v27_v0 = vstv %s5115_s29 }
  0x1f   :  { %28 = vst [vmem:[#allocation4] sm:$0x1] %v27_v0 }
  0x20   :  { %29 = vsyncpa [#allocation6], 0 }
  0x21   :  { %31 = vsyncpa [#allocation6 + $0x1], 0 }
  0x22   :  { %32 = vsyncpa [#allocation9], 0 }
  0x23   :  { %34 = vsyncpa [#allocation9 + $0x1], 0 }
  0x24   :  { %35 = vsyncpa [#allocation12], 0 }
  0x25   :  { %37 = vsyncpa [#allocation12 + $0x1], 0 }
  0x26   :  { %38 = vsyncpa [#allocation15], 0 }
  0x27   :  { %40 = vsyncpa [#allocation15 + $0x1], 0 }
  0x28   :  { %41 = vsyncpa [#allocation7], 0 }
  0x29   :  { %43 = vsyncpa [#allocation7 + $0x1], 0  ;;  %s4300_s30 = smov 0   ;;  %s4302_s4 = smov 0  }
  0x2a   :  { %s4304_s0 = smov 0   ;;  %s4306_s23 = smov 0  }
  0x2b   :  { %s4308_s1 = smov 0   ;;  %s4310_s5 = smov 0  }
  0x2c   :  { %s4312_s24 = smov 0   ;;  %s4314_s6 = smov 0  }
  0x2d   :  { %s4316_s25 = smov 0   ;;  %s4318_s26 = smov 0  }
  0x2e   :  { %s4320_s2 = smov 0  }
  0x2f LB: > { %5116 = sst [smem:[#allocation23_spill]] %s4118_s30  ;;  %s4354_s27 = sadd.s32 4294967295, %s4158_s2   ;;  %s4158_s2 = sphi %s4320_s2, %s49_s2   ;;  %s4154_s26 = sphi %s4318_s26, %s5188_s26   ;;  %s4150_s25 = sphi %s4316_s25, %s5187_s25   ;;  %s4146_s6 = sphi %s4314_s6, %s5186_s6   ;;  %s4142_s24 = sphi %s4312_s24, %s5185_s24   ;;  %s4138_s5 = sphi %s4310_s5, %s5184_s5   ;;  %s4134_s1 = sphi %s4308_s1, %s5192_s1   ;;  %s4130_s23 = sphi %s4306_s23, %s5191_s23   ;;  %s4126_s0 = sphi %s4304_s0, %s5182_s0   ;;  %s4122_s4 = sphi %s4302_s4, %s5190_s4   ;;  %s4118_s30 = sphi %s4300_s30, %s5189_s30  }
  0x30   : > { %5117 = sst [smem:[#allocation24_spill]] %s4126_s0  ;;  %s3144_s3 = sadd.s32 4294967294, %s4158_s2  }
  0x31   : > { %5118 = sst [smem:[#allocation25_spill]] %s4138_s5  ;;  %s58_s28 = sadd.s32 1, %s4150_s25 }
  0x32   : > { %5119 = sst [smem:[#allocation26_spill]] %s4142_s24  ;;  %s61_s29 = sadd.s32 1, %s4154_s26 }
  0x33   : > { %5120 = sst [smem:[#allocation27_spill]] %s4150_s25  ;;  %p59_p0 = scmp.ge.s32.totalorder %s58_s28, 2 }
  0x34   : > { %5121 = sst [smem:[#allocation28_spill]] %s4154_s26  ;;  %s251_s22 = sadd.s32 1, %s4138_s5 }
  0x35   : > { %5122 = sst [smem:[#allocation29_spill]] %s4158_s2  ;;  %p258_p1 = scmp.ne.s32.totalorder %s4138_s5, %s4134_s1 }
  0x36   : > { %p259_p2 = scmp.eq.s32.totalorder %s4158_s2, 0  ;;  %s5194_s28 = smov (%p59_p0, %s58_s28), 0 }
  0x37   : > { %5123 = sst [smem:[#allocation30_spill]] %s5194_s28  ;;  %s5196_s29 = smov (!%p59_p0, %s61_s29), %s4154_s26 }
  0x38   : > { %s248_s21 = ssub.s32 %s4150_s25, %s5194_s28  ;;  %p4368_p3 = por %p259_p2, %p258_p1 }
  0x39   : > { %p63_p4 = scmp.ge.s32.totalorder %s5196_s29, 2  ;;  %p249_p5 = scmp.eq.s32.totalorder %s248_s21, 0 }
  0x3a   : > { %p264_p6 = scmp.ne.s32.totalorder %s4134_s1, %s4130_s23  ;;  %p265_p7 = scmp.eq.s32.totalorder %s4354_s27, 0 }
  0x3b   : > { %s5198_s29 = smov (%p63_p4, %s5196_s29), 0  ;;  %s605_s17 = sadd.s32 1, %s4126_s0 }
  0x3c   : > { %5125 = sst [smem:[#allocation31_spill]] %s5198_s29  ;;  %p4379_p8 = por %p265_p7, %p264_p6 }
  0x3d   : > { %s4377_s19 = scalar_select %p249_p5, %s4138_s5, %s251_s22  }
  0x3e   : > { %s602_s18 = ssub.s32 %s4154_s26, %s5198_s29  ;;  %p615_p10 = scmp.ne.s32.totalorder %s4126_s0, %s4122_s4 }
  0x3f   : > { %5126 = sst [smem:[#allocation32_spill]] %s4377_s19  ;;  %p603_p9 = scmp.eq.s32.totalorder %s602_s18, 0 }
  0x40   : > { %p616_p11 = scmp.eq.s32.totalorder %s4354_s27, 3  ;;  %p621_p13 = scmp.ne.s32.totalorder %s4122_s4, %s4118_s30 }
  0x41   : > { %s4390_s21 = scalar_select %p603_p9, %s4126_s0, %s605_s17  }
  0x42   : > { %p4392_p12 = por %p616_p11, %p615_p10  ;;  %p622_p0 = scmp.eq.s32.totalorder %s3144_s3, 3 }
  0x43   : > { %5128 = sst [smem:[#allocation33_spill]] %s4390_s21  ;;  %p3651_p1 = scmp.lt.s32.totalorder %s4158_s2, 4 }
  0x44   : > { %s5129_s23 = scalar_select %p4392_p12, 1, 0 }
  0x45   : > { %s4400_s22 = sand.u32 1, %s4138_s5   ;;  %p4402_p2 = por %p622_p0, %p621_p13 }
  0x46   : > { %5130 = sst [smem:[#allocation34_spill]] %s5129_s23  ;;  %s4407_s18 = sshll.u32 %s4400_s22, 4 }
  0x47   : > { %s5131_s19 = scalar_select %p4402_p2, 1, 0 }
  0x48   : > { %s4410_s17 = sshll.u32 %s4150_s25, 4  ;;  %p4414_p4 = pnand %p3651_p1, %p4368_p3 }
  0x49   : > { %5132 = sst [smem:[#allocation35_spill]] %s5131_s19  ;;  %s4419_s3 = sand.u32 1, %s4158_s2  }
  0x4a   : > { %s5134_s9 = sld [smem:[#allocation45_spill]]  ;;  %s711_s0 = scalar_lea.vmem [#allocation8], %s4407_s18 }
  0x4b   : > { %s719_s19 = sshll.u32 %s711_s0, 4  ;;  %p3167_p3 = scmp.ge.s32.totalorder %s4158_s2, 1  ;;  %s720_s19 = int_to_ptr.vmem [resolvable:$true] %s719_s19 }
  0x4c   : > { %s5086_s20 = scalar_lea.sflag [#allocation9], %s4419_s3  ;;  %s4160_s23 = smov 64  }
  0x4d   : > { %s4161_s12 = smov 4   ;;  %p867_p5 = scmp.lt.s32.totalorder %s4158_s2, 5 }
  0x4e   : > { %s5135_s13 = sld [smem:[#allocation49_spill]]  ;;  %s767_s10 = scalar_lea.vmem [#allocation11], %s4407_s18 }
  0x4f   : > { %p4440_p6 = pnand %p3167_p3, %p867_p5  ;;  %s775_s7 = sshll.u32 %s767_s10, 4  ;;  %s776_s7 = int_to_ptr.vmem [resolvable:$true] %s775_s7 }
  0x50   : > { %s716_s21 = scalar_lea.hbm %s5134_s9, %s4410_s17  ;;  %s5137_s15 = sld [smem:[#allocation51_spill]] }
  0x51   : > { %s717_s30 = sshll.u32 %s716_s21, 4  ;;  %s5090_s10 = scalar_lea.sflag [#allocation15], %s4419_s3  ;;  %s718_s30 = int_to_ptr.hbm [resolvable:$true] %s717_s30 }
  0x52   : > { %3631 = dma.hbm_to_vmem [thread:$0]  (!%p4414_p4), %s718_s30, 256, %s720_s19, %s5086_s20, %s4160_s23, %s4160_s23, %s4161_s12  }
  0x53   : > { %s764_s19 = scalar_lea.sflag [#allocation12], %s4419_s3  ;;  %s811_s20 = scalar_lea.vmem [#allocation14], %s4407_s18 }
  0x54   : > { %s772_s26 = scalar_lea.hbm %s5135_s13, %s4410_s17  ;;  %s819_s13 = sshll.u32 %s811_s20, 4  ;;  %s820_s13 = int_to_ptr.vmem [resolvable:$true] %s819_s13 }
  0x55   : > { %s773_s9 = sshll.u32 %s772_s26, 4  ;;  %s5138_s8 = sld [smem:[#allocation44_spill]]  ;;  %s774_s9 = int_to_ptr.hbm [resolvable:$true] %s773_s9 }
  0x56   : > { %3637 = dma.hbm_to_vmem [thread:$0]  (!%p4414_p4), %s774_s9, 256, %s776_s7, %s764_s19, %s4160_s23, %s4160_s23, %s4161_s12  }
  0x57   : > { %s815_s5 = scalar_lea.hbm %s5137_s15, %s4410_s17  ;;  %s689_s9 = scalar_lea.vmem [#allocation5], %s4407_s18 }
  0x58   : > { %s817_s26 = sshll.u32 %s815_s5, 4  ;;  %s697_s30 = sshll.u32 %s689_s9, 4  ;;  %s818_s26 = int_to_ptr.hbm [resolvable:$true] %s817_s26  ;;  %s698_s30 = int_to_ptr.vmem [resolvable:$true] %s697_s30 }
  0x59   : > { %3643 = dma.hbm_to_vmem [thread:$0]  (!%p4414_p4), %s818_s26, 256, %s820_s13, %s5090_s10  }
  0x5a   : > { %s686_s20 = scalar_lea.sflag [#allocation6], %s4400_s22  ;;  %s5139_s11 = sld [smem:[#allocation47_spill]] }
  0x5b   : > { %s694_s7 = scalar_lea.hbm %s5138_s8, %s4410_s17  ;;  %s739_s24 = scalar_lea.vmem [#allocation10], %s4407_s18 }
  0x5c   : > { %s695_s0 = sshll.u32 %s694_s7, 4  ;;  %s747_s2 = sshll.u32 %s739_s24, 4  ;;  %s696_s0 = int_to_ptr.hbm [resolvable:$true] %s695_s0  ;;  %s748_s2 = int_to_ptr.vmem [resolvable:$true] %s747_s2 }
  0x5d   : > { %3628 = dma.hbm_to_vmem [thread:$0]  (!%p4414_p4), %s696_s0, 256, %s698_s30, %s686_s20, %s4160_s23, %s4160_s23, %s4161_s12  }
  0x5e   : > { %s3159_s7 = sshll.u32 %s4400_s22, 8  ;;  %s5140_s9 = scalar_lea.sflag [#allocation9], %s4419_s3 }
  0x5f   : > { %s3530_s30 = sshll.u32 %s4150_s25, 8  ;;  %s5141_s14 = sld [smem:[#allocation50_spill]] }
  0x60   : > { %s744_s26 = scalar_lea.hbm %s5139_s11, %s4410_s17  ;;  %s789_s5 = scalar_lea.vmem [#allocation13], %s3159_s7 }
  0x61   : > { %s745_s10 = sshll.u32 %s744_s26, 4  ;;  %s797_s18 = sshll.u32 %s789_s5, 4  ;;  %s746_s10 = int_to_ptr.hbm [resolvable:$true] %s745_s10  ;;  %s798_s18 = int_to_ptr.vmem [resolvable:$true] %s797_s18 }
  0x62   : > { %3634 = dma.hbm_to_vmem [thread:$0]  (!%p4414_p4), %s746_s10, 256, %s748_s2, %s5140_s9, %s4160_s23, %s4160_s23, %s4161_s12  }
  0x63   : > { %s4162_s26 = smov 1024   ;;  %s5142_s16 = sld [smem:[#allocation52_spill]] }
  0x64   : > { %s830_s2 = scalar_lea.vmem [#allocation16], %s3159_s7  ;;  %s5143_s0 = scalar_lea.sflag [#allocation15], %s4419_s3 }
  0x65   : > { %s794_s17 = scalar_lea.hbm %s5141_s14, %s3530_s30  ;;  %s838_s9 = sshll.u32 %s830_s2, 4  ;;  %s839_s9 = int_to_ptr.vmem [resolvable:$true] %s838_s9 }
  0x66   : > { %s795_s13 = sshll.u32 %s794_s17, 4  ;;  %s4507_s20 = sand.u32 (!%p4440_p6), 1, %s4134_s1   ;;  %s796_s13 = int_to_ptr.hbm [resolvable:$true] %s795_s13 }
  0x67   : > { %3640 = dma.hbm_to_vmem [thread:$0]  (!%p4414_p4), %s796_s13, 4096, %s798_s18, %s764_s19, %s4162_s26, %s4162_s26, %s4160_s23  }
  0x68   : > { %871 = sbr.rel (%p4440_p6) target bundleno = 3779 (0xec3), region = 108  ;;  %s4510_s19 = sshll.u32 (!%p4440_p6), %s4507_s20, 4 }
  0x69   : > { %s835_s12 = scalar_lea.hbm %s5142_s16, %s3530_s30  ;;  %s874_s7 = scalar_lea.sflag (!%p4440_p6), [#allocation6], %s4507_s20 }
  0x6a   : > { %s836_s10 = sshll.u32 %s835_s12, 4  ;;  %s837_s10 = int_to_ptr.hbm [resolvable:$true] %s836_s10 }
  0x6b   : > { %3646 = dma.hbm_to_vmem [thread:$0]  (!%p4414_p4), %s837_s10, 4096, %s839_s9, %s5143_s0, %s4162_s26, %s4162_s26, %s4160_s23  }
  0x6d   : > { %4097 = dma.done.wait (%p4379_p8), %s874_s7, 256  }
  0x6e   : > { %4099 = vsyncadd (%p4379_p8), %s874_s7, 4294967040  ;;  %s883_s29 = sand.u32 1, %s4354_s27  }
  0x6f   : > { %s884_s23 = scalar_lea.sflag [#allocation9], %s883_s29 }
  0x70   : > { %4101 = dma.done.wait (%p4379_p8), %s884_s23, 512  }
  0x71   : > { %4103 = vsyncadd (%p4379_p8), %s884_s23, 4294966784  ;;  %s904_s17 = scalar_lea.sflag [#allocation12], %s883_s29 }
  0x72   : > { %4105 = dma.done.wait (%p4379_p8), %s904_s17, 4352  }
  0x73   : > { %4107 = vsyncadd (%p4379_p8), %s904_s17, 4294962944  ;;  %s3172_s27 = sshll.u32 %s4507_s20, 8  ;;  %s924_s13 = scalar_lea.sflag [#allocation15], %s883_s29 }
  0x74   : > { %s4531_s18 = scalar_lea.vmem [#allocation13], %s3172_s27 }
  0x75   : > { %4109 = dma.done.wait (%p4379_p8), %s924_s13, 4352  }
  0x76   : > { %4111 = vsyncadd (%p4379_p8), %s924_s13, 4294962944  ;;  %s5144_s22 = sld [smem:[#allocation26_spill]]  ;;  %p1059_p7 = scmp.lt.s32.totalorder %s4146_s6, 1 }
  0x77   : > { %s5145_s0 = sld [smem:[#allocation37_spill]]  ;;  %s5153_s14 = sand.u32 1, %s4122_s4  }
  0x78   : > { %s1060_s12 = scalar_select %p1059_p7, %s4146_s6, 1 }
  0x79   : > { %s5146_s17 = sld [smem:[#allocation42_spill]] }
  0x7a   : > { %s3532_s2 = sshll.u32 %s1060_s12, 3  ;;  %s5147_s3 = sld [smem:[#allocation43_spill]] }
  0x7b   : > { %s5148_s8 = sld [smem:[#allocation46_spill]] }
  0x7c   : > { %p1064_p9 = scmp.lt.s32.totalorder %s5144_s22, 1  ;;  %s5149_s15 = sld [smem:[#allocation48_spill]] }
  0x7d   : > { %s4548_s20 = scalar_lea.vmem %s5145_s0, %s3532_s2  ;;  %s5150_s0 = sld [smem:[#allocation53_spill]] }
  0x7e   : > { %s4543_s10 = scalar_select %p1064_p9, %s5144_s22, 1 }
  0x7f   : > { %s5151_s23 = sld [smem:[#allocation54_spill]]  ;;  %p3182_p8 = scmp.ne.s32.totalorder %s5144_s22, 0 }
  0x80   : > { %s3533_s7 = sshll.u32 %s4543_s10, 4  ;;  %s1071_s21 = scalar_lea.vmem %s5147_s3, %s4543_s10 }
  0x81   : > { %s1068_s13 = scalar_lea.vmem %s5146_s17, %s3533_s7  ;;  %s1074_s11 = scalar_lea.vmem %s5148_s8, %s4543_s10 }
  0x82   : > { %s1077_s16 = scalar_lea.vmem %s5149_s15, %s4543_s10  ;;  %s3179_s28 = sshll.u32 %s4543_s10, 2 }
  0x83   : > { %s4570_s25 = scalar_lea.vmem %s5150_s0, %s3179_s28  ;;  %s5152_s26 = sld [smem:[#allocation55_spill]] }
  0x84   : > { %s4582_s8 = scalar_lea.vmem [#allocation16], %s3172_s27  ;;  %s4586_s15 = scalar_lea.vmem [#allocation17], %s5153_s14 }
  0x85   : > { %s4575_s17 = scalar_lea.vmem %s5151_s23, %s3179_s28  ;;  %1094 = sbr.rel (%p3182_p8) target bundleno = 142 (0x8e), region = 140 }
  0x86   : > { %s5154_s2 = sld [smem:[#allocation36_spill]] (!%p3182_p8) }
  0x89   : > { %s4580_s30 = scalar_lea.vmem %s5152_s26, %s3179_s28 }
  0x8a   : > { %vm1096_vm0 = vcmask 257024  }
  0x8c   : > { %v1095_v1 = vld [vmem:[%s5154_s2] sm:$0xf] }
  0x8d   : > { %1097 = vst.msk [vmem:[#allocation2] sm:$0xf] %vm1096_vm0, %v1095_v1 }
  0x8e PF: > { %v3536_v2 = vld [vmem:[%s1068_s13 + $0x8] sm:$0xff]  ;;  %v3535_v3 = vld [vmem:[%s1068_s13] sm:$0xff]  ;;  %vm1143_vm1 = vcmask 261120   ;;  %s4163_s27 = smov 104   ;;  %s4164_s22 = smov 120   ;;  %vm1166_vm2 = vcmask 64512  }
  0x8f   : > { %1153 = vmatpush.bf16.msra.mxu0 %v3536_v2  ;;  %v3765_v6 = vld [vmem:[%s1071_s21] ss:$0 sm:$0xff]  ;;  %s4165_s13 = smov 96   ;;  %s4166_s21 = smov 80   ;;  %v4170_v16 = vmov 0   ;;  %vm1186_vm4 = vcmask 27648  }
  0x90   : > { %s4167_s28 = smov 72   ;;  %s4168_s9 = smov 88   ;;  %3763 = vset.pattern.permute.xlu1 %v4170_v16  ;;  %3764 = vset.pattern.permute.xlu0 %v4170_v16  ;;  %v4171_v28 = vmov -1e+30   ;;  %vm1205_vm5 = vcmask 1041408   ;;  %vm1201_vm6 = vcmask 31744  }
  0x91   : > { %s4169_s0 = smov 112   ;;  %s5155_s23 = sld [smem:[#allocation38_spill]]  ;;  %vm1222_vm7 = vcmask 60416   ;;  %vm1284_vm8 = vcmask 126016   ;;  %vm1346_vm9 = vcmask 191616   ;;  %vm1408_vm10 = vcmask 257216  }
  0x92   : > { %s5156_s26 = sld [smem:[#allocation39_spill]]  ;;  %s4172_s14 = smov 64   ;;  %vm1447_vm11 = vcmask 257024  }
  0x93   : > { %1154 = vmatpush.bf16.msra.mxu0 %v3535_v3  ;;  %s4173_s24 = smov 40   ;;  %s4174_s12 = smov 56  }
  0x94   : > { %v4592_v4 = vld [vmem:[#allocation2] sm:$0xf]  ;;  %s4175_s2 = smov 48   ;;  %s4176_s29 = smov 8  }
  0x95   : > { %v1122_v5 = vpack.c.bf16 %v4592_v4, %v4592_v4  ;;  %s4177_s7 = smov 24   ;;  %s5157_s3 = scalar_lea.vmem [#allocation5], %s4510_s19 }
  0x96   : > { %s5158_s5 = smov %s5157_s3 }
  0x97   : > { %3191 = vmatmul.msk.bf16.vlgmr.msra.gmra.mxu0 %vm1143_vm1, %v1122_v5  ;;  %v1098_v17 = vld [vmem:[%s5155_s23] sm:$0xf]  ;;  %s4178_s23 = smov 16  }
  0x98   : > { %v3766_v26 = vld [vmem:[%s5156_s26] ss:$0 sm:$0xff]  ;;  %s5159_s26 = scalar_lea.vmem [#allocation10], %s4510_s19 }
 0x114   : > { %v1156_v7 = vpop.f32.mrf.mxu0 }
 0x115   : > { %v1157_v8 = vadd.f32 %v3765_v6, %v1156_v7 }
 0x117   : > { %v1160_v9 = vpack.c.bf16 %v1157_v8, %v1157_v8 }
 0x119   : > { %v1162_v10 = vunpack.c.l.b16 %v1160_v9 }
 0x11b   : > { %v4597_v11 = vpack.c.b16 %v1162_v10, %v1162_v10 }
 0x11c   : > { %v1158_v12 = vpop.f32.mrf.mxu0 }
 0x11d   : > { %1348 = vrot.lane.b32.xlu2 %v4597_v11, %s4163_s27  ;;  %1224 = vrot.lane.b32.xlu1 %v4597_v11, %s4164_s22 }
 0x11e   : > { %1164 = vrot.lane.b32.xlu0 %v4597_v11, %s4165_s13 }
 0x125   : > { %1288 = vrot.lane.b32.xlu2 %v4597_v11, %s4166_s21  ;;  %1350 = vrot.lane.b32.xlu1 %v4597_v11, %s4167_s28 }
 0x126   : > { %1226 = vrot.lane.b32.xlu0 %v4597_v11, %s4168_s9 }
 0x12d   : > { %1102 = vperm.xlu1 %3763, %v1098_v17  }
 0x12e   : > { %1286 = vrot.lane.b32.xlu0 %v4597_v11, %s4169_s0 }
 0x177   : > { %v1349_v13 = vpop.permute.xlu2 %1348 }
 0x17f   : > { %v1289_v14 = vpop.permute.xlu2 %1288 }
 0x180   : > { %v1294_v15 = vsel %vm1166_vm2, %v1289_v14, 0 }
 0x181   : > { %1303 = vmatpush.bf16.xpose.msrb.mxu0 %v1294_v15 }
 0x18f   : > { %v1225_v18 = vpop.permute.xlu1 %1224 }
 0x190   : > { %v1165_v19 = vpop.permute.xlu0 %1164 }
 0x191   : > { %v1171_v20 = vsel %vm1166_vm2, %v1165_v19, 0 }
 0x192   : > { %1180 = vmatpush.bf16.xpose.msra.mxu1 %v1171_v20 }
 0x197   : > { %v1351_v21 = vpop.permute.xlu1 %1350 }
 0x198   : > { %v1227_v22 = vpop.permute.xlu0 %1226  ;;  %v1356_v23 = vsel %vm1166_vm2, %v1351_v21, 0 }
 0x199   : > { %3192 = vmatmul.msk.bf16.vlgmr.msra.gmra.mxu1 %vm1166_vm2, %v1160_v9  ;;  %v1232_v24 = vsel %vm1166_vm2, %v1227_v22, 0 }
 0x19a   : > { %1241 = vmatpush.bf16.xpose.msra.mxu3 %v1232_v24 }
 0x19f   : > { %v4627_v27 = vpop.permute.xlu1 %1102 }
 0x1a0   : > { %v1287_v25 = vpop.permute.xlu0 %1286  ;;  %vm1108_vm3 = vcmp.eq.f32.partialorder %v4627_v27, %v3766_v26 }
 0x1a1   : > { %3194 = vmatmul.msk.bf16.vlgmr.msra.gmra.mxu3 %vm1166_vm2, %v1225_v18  ;;  %3196 = vmatmul.msk.bf16.vlgmr.msrb.gmra.mxu0 %vm1166_vm2, %v1287_v25  ;;  %v1109_v29 = vsel %vm1108_vm3, 0.0, %v4171_v28  ;;  %vm1587_vm3 = vcmask 125952  }
 0x1a2   : > { %1365 = vmatpush.bf16.xpose.msrb.mxu3 %v1356_v23 }
 0x1b1   : > { %3198 = vmatmul.msk.bf16.vlgmr.msrb.gmra.mxu3 %vm1166_vm2, %v1349_v13 }
 0x216   : > { %v1182_v30 = vpop.f32.mrf.mxu1 }
 0x217   : > { %v1183_v31 = vadd.f32 %v1182_v30, %v1109_v29 }
 0x219   : > { %v1187_v32 = vsel %vm1186_vm4, %v1183_v31, -inf }
 0x21a   : > { %1188 = vmax.xlane.f32.xlu2 %v1187_v32 }
 0x21e   : > { %v1184_v33 = vpop.f32.mrf.mxu1  ;;  %v1305_v34 = vpop.f32.mrf.mxu0 }
 0x21f   : > { %v1306_v35 = vadd.f32 %v1305_v34, %v1109_v29 }
 0x221   : > { %v1309_v36 = vsel %vm1186_vm4, %v1306_v35, -inf }
 0x222   : > { %1310 = vmax.xlane.f32.xlu2 %v1309_v36 }
 0x224   : > { %v1243_v37 = vpop.f32.mrf.mxu3 }
 0x225   : > { %v1244_v38 = vadd.f32 %v1243_v37, %v1109_v29  ;;  %v3538_v37 = vld [vmem:[%s5157_s3 + $0x8] sm:$0xff] }
 0x226   : > { %v1307_v39 = vpop.f32.mrf.mxu0  ;;  %1437 = vmatpush.bf16.msra.mxu0 %v3538_v37  ;;  %v3769_v37 = vld [vmem:[%s1074_s11] ss:$0 sm:$0xff] }
 0x227   : > { %v1247_v40 = vsel %vm1186_vm4, %v1244_v38, -inf }
 0x228   : > { %1248 = vmax.xlane.f32.xlu0 %v1247_v40 }
 0x22c   : > { %v1245_v41 = vpop.f32.mrf.mxu3 }
 0x234   : > { %v1367_v42 = vpop.f32.mrf.mxu3 }
 0x235   : > { %v1368_v43 = vadd.f32 %v1367_v42, %v1109_v29 }
 0x237   : > { %v1371_v44 = vsel %vm1186_vm4, %v1368_v43, -inf }
 0x238   : > { %1372 = vmax.xlane.f32.xlu1 %v1371_v44  ;;  %v4664_v44 = vld [vmem:[%s4570_s25] sm:$0x7] }
 0x23c   : > { %v1369_v45 = vpop.f32.mrf.mxu3  ;;  %1199 = vrot.lane.b32.xlu0 %v4597_v11, %s4172_s14  ;;  %s5160_s14 = smov %s5159_s26 }
 0x23d   : > { %v1445_v45 = vperm.slane %v4664_v44, 0 }
 0x244   : > { %1383 = vrot.lane.b32.xlu0 %v4597_v11, %s4173_s24 }
 0x28d   : > { %v1189_v46 = vpop.xlane.xlu2 %1188 }
 0x28e   : > { %v1190_v47 = vsub.f32 %v1183_v31, %v1189_v46 }
 0x290   : > { %v1191_v48 = vmul.f32 1.442695, %v1190_v47 }
 0x292   : > { %3770 = vpow2.f32 %v1191_v48 }
 0x295   : > { %v1311_v49 = vpop.xlane.xlu2 %1310 }
 0x296   : > { %v1312_v50 = vsub.f32 %v1306_v35, %v1311_v49 }
 0x298   : > { %v3771_v51 = vpop.eup %3770  ;;  %v1313_v52 = vmul.f32 1.442695, %v1312_v50 }
 0x299   : > { %v1193_v53 = vsel %vm1186_vm4, %v3771_v51, 0.0 }
 0x29a   : > { %3772 = vpow2.f32 %v1313_v52  ;;  %1194 = vadd.xlane.f32.xlu2 %v1193_v53  ;;  %v3542_v52 = vld [vmem:[%s5159_s26 + $0x8] sm:$0xff] }
 0x29b   : > { %v1249_v54 = vpop.xlane.xlu0 %1248  ;;  %1552 = vmatpush.bf16.msra.mxu3 %v3542_v52  ;;  %v3541_v53 = vld [vmem:[%s5160_s14] sm:$0xff]  ;;  %s5165_s14 = sld [smem:[#allocation40_spill]] }
 0x29c   : > { %v1250_v55 = vsub.f32 %v1244_v38, %v1249_v54  ;;  %v3537_v38 = vld [vmem:[%s5158_s5] sm:$0xff] }
 0x29d   : > { %1438 = vmatpush.bf16.msra.mxu0 %v3537_v38 }
 0x29e   : > { %v1251_v56 = vmul.f32 1.442695, %v1250_v55  ;;  %v3534_v55 = vld [vmem:[%s4548_s20] sm:$0xff]  ;;  %s5161_s20 = scalar_lea.vmem [#allocation8], %s4510_s19 }
 0x29f   : > { %1553 = vmatpush.bf16.msra.mxu3 %v3541_v53  ;;  %s5162_s24 = smov %s5161_s20 }
 0x2a0   : > { %v3773_v57 = vpop.eup %3772  ;;  %3774 = vpow2.f32 %v1251_v56 }
 0x2a1   : > { %v1315_v58 = vsel %vm1186_vm4, %v3773_v57, 0.0 }
 0x2a2   : > { %1316 = vadd.xlane.f32.xlu1 %v1315_v58  ;;  %3230 = vmatmul.msk.bf16.vlgmr.msra.gmra.mxu3 %vm1143_vm1, %v3534_v55 }
 0x2a6   : > { %v3775_v59 = vpop.eup %3774 }
 0x2a7   : > { %v1253_v60 = vsel %vm1186_vm4, %v3775_v59, 0.0 }
 0x2aa   : > { %1254 = vadd.xlane.f32.xlu1 %v1253_v60 }
 0x2ab   : > { %v1373_v61 = vpop.xlane.xlu1 %1372 }
 0x2ac   : > { %v1374_v62 = vsub.f32 %v1368_v43, %v1373_v61 }
 0x2ae   : > { %v1375_v63 = vmul.f32 1.442695, %v1374_v62  ;;  %v1200_v0 = vpop.permute.xlu0 %1199 }
 0x2af   : > { %v1207_v1 = vsel %vm1205_vm5, %v1200_v0, 0 }
 0x2b0   : > { %3776 = vpow2.f32 %v1375_v63  ;;  %1216 = vmatpush.bf16.msra.mxu2 %v1207_v1  ;;  %v3540_v1 = vld [vmem:[%s5161_s20 + $0x8] sm:$0xff] }
 0x2b2   : > { %1259 = vrot.lane.b32.xlu2 %v4597_v11, %s4174_s12 }
 0x2b6   : > { %v3777_v2 = vpop.eup %3776  ;;  %v1384_v10 = vpop.permute.xlu0 %1383 }
 0x2b7   : > { %v1377_v3 = vsel %vm1186_vm4, %v3777_v2, 0.0  ;;  %v1389_v14 = vsel %vm1205_vm5, %v1384_v10, 0 }
 0x2b8   : > { %1378 = vadd.xlane.f32.xlu1 %v1377_v3  ;;  %v3768_v3 = vld [vmem:[%s1077_s16] ss:$0 sm:$0xff] }
 0x2d1   : > { %1321 = vrot.lane.b32.xlu1 %v4597_v11, %s4175_s2 }
 0x30d   : > { %v1195_v5 = vpop.xlane.xlu2 %1194 }
 0x30e   : > { %3778 = vrcp.f32 %v1195_v5 }
 0x314   : > { %v3779_v6 = vpop.eup %3778 }
 0x315   : > { %v1317_v7 = vpop.xlane.xlu1 %1316  ;;  %v1260_v8 = vpop.permute.xlu2 %1259  ;;  %v1197_v9 = vmul.f32 %v3779_v6, %v3771_v51  ;;  %v4179_v51 = vmov 32.0  }
 0x316   : > { %v1265_v12 = vsel %vm1205_vm5, %v1260_v8, 0 }
 0x317   : > { %1274 = vmatpush.bf16.msrb.mxu2 %v1265_v12  ;;  %v1198_v13 = vpack.c.bf16 %v1197_v9, %v1197_v9 }
 0x319   : > { %3193 = vmatmul.msk.bf16.vlgmr.msra.gmra.mxu2 %vm1201_vm6, %v1198_v13 }
 0x31b   : > { %1398 = vmatpush.bf16.msra.mxu2 %v1389_v14 }
 0x31d   : > { %v1255_v15 = vpop.xlane.xlu1 %1254 }
 0x31e   : > { %3780 = vrcp.f32 %v1255_v15 }
 0x324   : > { %v3781_v11 = vpop.eup %3780 }
 0x325   : > { %v1257_v16 = vmul.f32 %v3781_v11, %v3775_v59  ;;  %v1555_v5 = vpop.f32.mrf.mxu3 }
 0x326   : > { %v1556_v8 = vadd.f32 %v3768_v3, %v1555_v5 }
 0x327   : > { %v1258_v17 = vpack.c.bf16 %v1257_v16, %v1257_v16 }
 0x328   : > { %v1561_v10 = vpack.c.bf16 %v1556_v8, %v1556_v8 }
 0x329   : > { %3195 = vmatmul.msk.bf16.vlgmr.msrb.gmra.mxu2 %vm1201_vm6, %v1258_v17 }
 0x32a   : > { %v1565_v14 = vunpack.c.l.b16 %v1561_v10 }
 0x32b   : > { %v1379_v18 = vpop.xlane.xlu1 %1378 }
 0x32c   : > { %3782 = vrcp.f32 %v1379_v18 }
 0x32d   : > { %3784 = vrcp.f32 %v1317_v7  ;;  %v1557_v12 = vpop.f32.mrf.mxu3 }
 0x32e   : > { %3786 = vrcp.f32 %v4179_v51  ;;  %v1558_v13 = vadd.f32 %v3768_v3, %v1557_v12 }
 0x330   : > { %v1562_v15 = vpack.c.bf16 %v1558_v13, %v1558_v13 }
 0x332   : > { %v3783_v19 = vpop.eup %3782  ;;  %v1566_v17 = vunpack.c.l.b16 %v1562_v15 }
 0x333   : > { %v1381_v20 = vmul.f32 %v3783_v19, %v3777_v2  ;;  %v3785_v22 = vpop.eup %3784  ;;  %v3539_v2 = vld [vmem:[%s5162_s24] sm:$0xff] }
 0x334   : > { %v1319_v23 = vmul.f32 %v3785_v22, %v3773_v57  ;;  %v3787_v54 = vpop.eup %3786  ;;  %v4689_v19 = vpack.c.b16 %v1566_v17, %v1565_v14  ;;  %v4696_v22 = vld [vmem:[%s4575_s17] sm:$0x7] }
 0x335   : > { %v1382_v21 = vpack.c.bf16 %v1381_v20, %v1381_v20  ;;  %v1452_v56 = vmul.f32 32.0, %v3787_v54  ;;  %vm1456_vm12 = vweird.f32 %v3787_v54 }
 0x336   : > { %v1320_v26 = vpack.c.bf16 %v1319_v23, %v1319_v23  ;;  %1626 = vrot.lane.b32.xlu1 %v4689_v19, %s4164_s22 }
 0x339   : > { %3199 = vmatmul.msk.bf16.vlgmr.msra.gmra.mxu2 %vm1201_vm6, %v1382_v21  ;;  %v1572_v21 = vsel %vm1166_vm2, %v4689_v19, 0 }
 0x33a   : > { %1581 = vmatpush.bf16.xpose.msrb.mxu2 %v1572_v21 }
 0x33e   : > { %1685 = vrot.lane.b32.xlu1 %v4689_v19, %s4169_s0 }
 0x343   : > { %v1322_v24 = vpop.permute.xlu1 %1321 }
 0x344   : > { %v1327_v25 = vsel %vm1205_vm5, %v1322_v24, 0  ;;  %v4699_v24 = vld [vmem:[%s4580_s30] sm:$0x7] }
 0x345   : > { %1336 = vmatpush.bf16.msrb.mxu1 %v1327_v25 }
 0x348   : > { %3197 = vmatmul.msk.bf16.vlgmr.msrb.gmra.mxu1 %vm1201_vm6, %v1320_v26  ;;  %v1477_v26 = vperm.slane %v4696_v22, 0 }
 0x349   : > { %1511 = vmatpush.bf16.msra.mxu1 %v3540_v1 }
 0x34d   : > { %1512 = vmatpush.bf16.msra.mxu1 %v3539_v2 }
 0x39c   : > { %v1218_v29 = vpop.f32.mrf.mxu2 }
 0x39d   : > { %1223 = vst.msk [vmem:[#allocation3] sm:$0xf] %vm1222_vm7, %v1218_v29 }
 0x3a4   : > { %v1220_v30 = vpop.f32.mrf.mxu2 }
 0x3a5   : > { %v1479_v30 = vperm.slane %v4699_v24, 0 }
 0x3ac   : > { %v1276_v31 = vpop.f32.mrf.mxu2 }
 0x3ad   : > { %1281 = vrot.lane.b32.xlu0 %v1276_v31, %s4176_s29 }
 0x3b4   : > { %v1278_v32 = vpop.f32.mrf.mxu2 }
 0x3bc   : > { %v1400_v33 = vpop.f32.mrf.mxu2 }
 0x3bd   : > { %1405 = vrot.lane.b32.xlu0 %v1400_v33, %s4177_s7 }
 0x3c4   : > { %v1402_v34 = vpop.f32.mrf.mxu2 }
 0x3c5   : > { %v1338_v35 = vpop.f32.mrf.mxu1 }
 0x3c6   : > { %1343 = vrot.lane.b32.xlu2 %v1338_v35, %s4178_s23  ;;  %v1627_v35 = vpop.permute.xlu1 %1626 }
 0x3cd   : > { %v1340_v36 = vpop.f32.mrf.mxu1 }
 0x3ce   : > { %v1632_v36 = vsel %vm1166_vm2, %v1627_v35, 0 }
 0x3cf   : > { %1641 = vmatpush.bf16.xpose.msrb.mxu1 %v1632_v36 }
 0x41f   : > { %v1282_v39 = vpop.permute.xlu0 %1281 }
 0x420   : > { %1285 = vst.msk [vmem:[#allocation3] sm:$0xf] %vm1284_vm8, %v1282_v39  ;;  %v1344_v40 = vpop.permute.xlu2 %1343 }
 0x421   : > { %1347 = vst.msk [vmem:[#allocation3] sm:$0xf] %vm1346_vm9, %v1344_v40  ;;  %v1686_v40 = vpop.permute.xlu1 %1685 }
 0x42f   : > { %v1406_v41 = vpop.permute.xlu0 %1405 }
 0x430   : > { %1409 = vst.msk [vmem:[#allocation3] sm:$0xf] %vm1408_vm10, %v1406_v41  ;;  %v1691_v41 = vsel %vm1166_vm2, %v1686_v40, 0 }
 0x431   : > { %1700 = vmatpush.bf16.xpose.msra.mxu2 %v1691_v41 }
 0x437   : > { %v1410_v42 = vld [vmem:[#allocation3] sm:$0xf] }
 0x438   : > { %v1411_v43 = vpack.c.bf16 %v1410_v42, %v1410_v42 }
 0x43a   : > { %3208 = vmatmul.msk.bf16.vlgmr.msra.gmra.mxu0 %vm1143_vm1, %v1411_v43 }
 0x4b7   : > { %v1440_v46 = vpop.f32.mrf.mxu0 }
 0x4b8   : > { %v1444_v47 = vadd.f32 %v1440_v46, %v4592_v4  ;;  %v1453_v4 = vsub.f32 1.0, %v1452_v56 }
 0x4ba   : > { %v1446_v48 = vadd.f32 %v1445_v45, %v1444_v47  ;;  %v1454_v57 = vmul.f32 %v3787_v54, %v1453_v4 }
 0x4bc   : > { %v1448_v49 = vsel %vm1447_vm11, %v1446_v48, 0.0  ;;  %v1455_v58 = vadd.f32 %v3787_v54, %v1454_v57 }
 0x4bd   : > { %1449 = vadd.xlane.f32.xlu2 %v1448_v49  ;;  %v3767_v49 = vld [vmem:[%s5165_s14] ss:$0 sm:$0xff] }
 0x4be   : > { %v4675_v59 = vsel %vm1456_vm12, %v3787_v54, %v1455_v58  ;;  %vm1114_vm0 = vcmp.eq.f32.partialorder %v4627_v27, %v3767_v49 }
 0x4bf   : > { %v1442_v50 = vpop.f32.mrf.mxu0  ;;  %v1115_v52 = vsel %vm1114_vm0, 0.0, %v4171_v28 }
 0x530   : > { %v1450_v60 = vpop.xlane.xlu2 %1449 }
 0x531   : > { %v1458_v61 = vmul.f32 %v4675_v59, %v1450_v60 }
 0x533   : > { %v1459_v62 = vsub.f32 %v1446_v48, %v1458_v61 }
 0x535   : > { %v1460_v63 = vmul.f32 %v1459_v62, %v1459_v62 }
 0x537   : > { %v1461_v0 = vsel %vm1447_vm11, %v1460_v63, 0.0 }
 0x538   : > { %1462 = vadd.xlane.f32.xlu0 %v1461_v0 }
 0x5ab   : > { %v1463_v6 = vpop.xlane.xlu0 %1462 }
 0x5ac   : > { %v1464_v7 = vmul.f32 %v1463_v6, %v4675_v59 }
 0x5ae   : > { %v1465_v9 = vadd.f32 1e-05, %v1464_v7 }
 0x5b0   : > { %3788 = vrsqrt.f32 %v1465_v9  ;;  %vm1472_vm14 = vweird.f32 %v1465_v9 }
 0x5b6   : > { %v3789_v11 = vpop.eup %3788 }
 0x5b7   : > { %v1467_v16 = vmul.f32 %v3789_v11, %v1465_v9  ;;  %vm1473_vm13 = vweird.f32 %v3789_v11 }
 0x5b8   : > { %vm1474_vm15 = vmor %vm1472_vm14, %vm1473_vm13 }
 0x5b9   : > { %v1468_v18 = vmul.f32 %v3789_v11, %v1467_v16 }
 0x5bb   : > { %v1469_v20 = vmul.f32 0.5, %v1468_v18 }
 0x5bd   : > { %v1470_v23 = vsub.f32 1.5, %v1469_v20 }
 0x5bf   : > { %v1471_v25 = vmul.f32 %v3789_v11, %v1470_v23 }
 0x5c1   : > { %v1475_v29 = vsel %vm1474_vm15, %v3789_v11, %v1471_v25 }
 0x5c2   : > { %v1476_v31 = vmul.f32 %v1475_v29, %v1459_v62 }
 0x5c4   : > { %v1478_v32 = vmul.f32 %v1477_v26, %v1476_v31 }
 0x5c6   : > { %v4705_v33 = vadd.f32 %v1479_v30, %v1478_v32 }
 0x5c8   : > { %v1481_v34 = vpack.c.bf16 %v4705_v33, %v4705_v33 }
 0x5ca   : > { %3217 = vmatmul.msk.bf16.vlgmr.msra.gmra.mxu1 %vm1143_vm1, %v1481_v34 }
 0x647   : > { %v1514_v38 = vpop.f32.mrf.mxu1 }
 0x648   : > { %v1515_v39 = vadd.f32 %v3769_v37, %v1514_v38 }
 0x64a   : > { %v1560_v42 = vpack.c.bf16 %v1515_v39, %v1515_v39 }
 0x64c   : > { %v1622_v43 = vunpack.c.l.b16 %v1560_v42  ;;  %3231 = vmatmul.msk.bf16.vlgmr.msrb.gmra.mxu2 %vm1166_vm2, %v1560_v42 }
 0x64e   : > { %v1623_v45 = vpack.c.b16 %v1622_v43, %v1622_v43 }
 0x64f   : > { %v1516_v46 = vpop.f32.mrf.mxu1 }
 0x650   : > { %1683 = vrot.lane.b32.xlu2 %v1623_v45, %s4169_s0  ;;  %1624 = vrot.lane.b32.xlu1 %v1623_v45, %s4164_s22 }
 0x658   : > { %1744 = vrot.lane.b32.xlu1 %v4689_v19, %s4163_s27 }
 0x660   : > { %1742 = vrot.lane.b32.xlu1 %v1623_v45, %s4163_s27  ;;  %s5166_s27 = scalar_lea.vmem [#allocation11], %s4510_s19 }
 0x661   : > { %s5167_s22 = smov %s5166_s27 }
 0x6aa   : > { %v1684_v47 = vpop.permute.xlu2 %1683 }
 0x6ab   : > { %3235 = vmatmul.msk.bf16.vlgmr.msra.gmra.mxu2 %vm1166_vm2, %v1684_v47 }
 0x6c2   : > { %v1625_v48 = vpop.permute.xlu1 %1624 }
 0x6c3   : > { %3233 = vmatmul.msk.bf16.vlgmr.msrb.gmra.mxu1 %vm1166_vm2, %v1625_v48 }
 0x6ca   : > { %v1745_v50 = vpop.permute.xlu1 %1744 }
 0x6cb   : > { %v1750_v51 = vsel %vm1166_vm2, %v1745_v50, 0 }
 0x6cc   : > { %1759 = vmatpush.bf16.xpose.msra.mxu1 %v1750_v51 }
 0x6cf   : > { %v1583_v53 = vpop.f32.mrf.mxu2 }
 0x6d0   : > { %v1584_v54 = vadd.f32 %v1583_v53, %v1115_v52 }
 0x6d2   : > { %v1743_v55 = vpop.permute.xlu1 %1742  ;;  %v1588_v56 = vsel %vm1587_vm3, %v1584_v54, -inf }
 0x6d3   : > { %3237 = vmatmul.msk.bf16.vlgmr.msra.gmra.mxu1 %vm1166_vm2, %v1743_v55  ;;  %1589 = vmax.xlane.f32.xlu1 %v1588_v56  ;;  %vm1603_vm2 = vcmask 130048  }
 0x6d7   : > { %v1585_v4 = vpop.f32.mrf.mxu2 }
 0x6ec   : > { %1600 = vrot.lane.b32.xlu1 %v4689_v19, %s4165_s13 }
 0x6f4   : > { %1718 = vrot.lane.b32.xlu1 %v4689_v19, %s4166_s21 }
 0x72e   : > { %v1702_v27 = vpop.f32.mrf.mxu2 }
 0x72f   : > { %v1703_v62 = vadd.f32 %v1702_v27, %v1115_v52 }
 0x731   : > { %v1706_v2 = vsel %vm1587_vm3, %v1703_v62, -inf }
 0x736   : > { %v1704_v57 = vpop.f32.mrf.mxu2 }
 0x737   : > { %v3544_v57 = vld [vmem:[%s5166_s27 + $0x8] sm:$0xff] }
 0x738   : > { %1828 = vmatpush.bf16.msrb.mxu2 %v3544_v57  ;;  %v3276_v57 = vld [vmem:[%s4531_s18 + $0x58] sm:$0xf0] }
 0x740   : > { %v1643_v58 = vpop.f32.mrf.mxu1 }
 0x741   : > { %v1644_v28 = vadd.f32 %v1643_v58, %v1115_v52  ;;  %v3543_v58 = vld [vmem:[%s5167_s22] sm:$0xff] }
 0x742   : > { %1829 = vmatpush.bf16.msrb.mxu2 %v3543_v58  ;;  %v3266_v58 = vld [vmem:[%s4531_s18 + $0x10] sm:$0xf] }
 0x743   : > { %v1647_v60 = vsel %vm1587_vm3, %v1644_v28, -inf }
 0x744   : > { %1648 = vmax.xlane.f32.xlu0 %v1647_v60 }
 0x746   : > { %v1590_v61 = vpop.xlane.xlu1 %1589 }
 0x747   : > { %v1591_v63 = vsub.f32 %v1584_v54, %v1590_v61 }
 0x748   : > { %v1645_v0 = vpop.f32.mrf.mxu1 }
 0x749   : > { %v1592_v1 = vmul.f32 1.442695, %v1591_v63  ;;  %v1836_v0 = vperm.slane %v4664_v44, 1 }
 0x74b   : > { %3790 = vpow2.f32 %v1592_v1 }
 0x74c   : > { %1707 = vmax.xlane.f32.xlu0 %v1706_v2 }
 0x750   : > { %v1761_v3 = vpop.f32.mrf.mxu1 }
 0x751   : > { %v3791_v5 = vpop.eup %3790  ;;  %v1762_v7 = vadd.f32 %v1761_v3, %v1115_v52 }
 0x752   : > { %v1594_v6 = vsel %vm1587_vm3, %v3791_v5, 0.0 }
 0x753   : > { %v1765_v9 = vsel %vm1587_vm3, %v1762_v7, -inf }
 0x754   : > { %1595 = vadd.xlane.f32.xlu0 %v1594_v6 }
 0x758   : > { %v1763_v8 = vpop.f32.mrf.mxu1 }
 0x75c   : > { %1766 = vmax.xlane.f32.xlu0 %v1765_v9 }
 0x75e   : > { %v1601_v10 = vpop.permute.xlu1 %1600 }
 0x75f   : > { %1614 = vmatpush.bf16.msrb.mxu0 %v1601_v10 }
 0x766   : > { %v1719_v12 = vpop.permute.xlu1 %1718 }
 0x767   : > { %1731 = vmatpush.bf16.msra.mxu0 %v1719_v12  ;;  %v3570_v12 = vld [vmem:[%s4531_s18 + $0xc4] sm:$0xf0] }
 0x770   : > { %1659 = vrot.lane.b32.xlu0 %v4689_v19, %s4168_s9 }
 0x7b7   : > { %v1649_v13 = vpop.xlane.xlu0 %1648 }
 0x7b8   : > { %v1650_v14 = vsub.f32 %v1644_v28, %v1649_v13  ;;  %v3562_v13 = vld [vmem:[%s4531_s18 + $0x8c] sm:$0xf] }
 0x7ba   : > { %v1651_v15 = vmul.f32 1.442695, %v1650_v14 }
 0x7bc   : > { %3792 = vpow2.f32 %v1651_v15  ;;  %v3324_v15 = vld [vmem:[%s4531_s18 + $0xc8] sm:$0xf0] }
 0x7bf   : > { %v1708_v11 = vpop.xlane.xlu0 %1707 }
 0x7c0   : > { %v1709_v16 = vsub.f32 %v1703_v62, %v1708_v11  ;;  %v3314_v11 = vld [vmem:[%s4531_s18 + $0x80] sm:$0xf] }
 0x7c2   : > { %v3793_v17 = vpop.eup %3792  ;;  %v1710_v18 = vmul.f32 1.442695, %v1709_v16  ;;  %v3569_v16 = vld [vmem:[%s4531_s18 + $0xbc] sm:$0xf0] }
 0x7c3   : > { %v1653_v20 = vsel %vm1587_vm3, %v3793_v17, 0.0 }
 0x7c4   : > { %3794 = vpow2.f32 %v1710_v18  ;;  %1654 = vadd.xlane.f32.xlu2 %v1653_v20  ;;  %v3315_v18 = vor.u32 %v3569_v16, %v3314_v11  ;;  %v3561_v20 = vld [vmem:[%s4531_s18 + $0x84] sm:$0xf]  ;;  %v3356_v11 = vld [vmem:[%s4531_s18 + $0xe8] sm:$0xf0]  ;;  %v3346_v16 = vld [vmem:[%s4531_s18 + $0xa0] sm:$0xf] }
 0x7c7   : > { %v1596_v21 = vpop.xlane.xlu0 %1595 }
 0x7c8   : > { %3796 = vrcp.f32 %v1596_v21  ;;  %v3316_v21 = vld [vmem:[%s4531_s18 + $0xc0] sm:$0xf0] }
 0x7ca   : > { %v3795_v23 = vpop.eup %3794 }
 0x7cb   : > { %v1712_v25 = vsel %vm1587_vm3, %v3795_v23, 0.0 }
 0x7cc   : > { %1713 = vadd.xlane.f32.xlu2 %v1712_v25  ;;  %v3258_v25 = vld [vmem:[%s4531_s18 + $0x8] sm:$0xf] }
 0x7ce   : > { %v3797_v26 = vpop.eup %3796 }
 0x7cf   : > { %v1598_v29 = vmul.f32 %v3797_v26, %v3791_v5  ;;  %v1767_v30 = vpop.xlane.xlu0 %1766  ;;  %v3554_v26 = vld [vmem:[%s4531_s18 + $0x44] sm:$0xf0] }
 0x7d0   : > { %v1768_v31 = vsub.f32 %v1762_v7, %v1767_v30  ;;  %v3259_v30 = vor.u32 %v3554_v26, %v3258_v25  ;;  %v3558_v25 = vld [vmem:[%s4531_s18 + $0x64] sm:$0xf0] }
 0x7d1   : > { %v1599_v32 = vpack.c.bf16 %v1598_v29, %v1598_v29  ;;  %v3546_v29 = vld [vmem:[%s4531_s18 + $0xc] sm:$0xf] }
 0x7d2   : > { %v1769_v34 = vmul.f32 1.442695, %v1768_v31  ;;  %v3260_v31 = vld [vmem:[%s4531_s18 + $0x48] sm:$0xf0] }
 0x7d3   : > { %3232 = vmatmul.msk.bf16.vlgmr.msrb.gmra.mxu0 %vm1603_vm2, %v1599_v32  ;;  %v3250_v32 = vld [vmem:[%s4531_s18] sm:$0xf] }
 0x7d4   : > { %3798 = vpow2.f32 %v1769_v34  ;;  %2102 = vmatpush.bf16.msrb.mxu0 %v3315_v18  ;;  %v3553_v34 = vld [vmem:[%s4531_s18 + $0x3c] sm:$0xf0]  ;;  %v3565_v18 = vld [vmem:[%s4531_s18 + $0xa4] sm:$0xf] }
 0x7da   : > { %v3799_v35 = vpop.eup %3798 }
 0x7db   : > { %v1771_v36 = vsel %vm1587_vm3, %v3799_v35, 0.0 }
 0x7dc   : > { %1772 = vadd.xlane.f32.xlu0 %v1771_v36  ;;  %v3251_v36 = vor.u32 %v3553_v34, %v3250_v32  ;;  %v3282_v32 = vld [vmem:[%s4531_s18 + $0x20] sm:$0xf] }
 0x7dd   : > { %v3557_v34 = vld [vmem:[%s4531_s18 + $0x5c] sm:$0xf0] }
 0x7de   : > { %2103 = vmatpush.bf16.msrb.mxu0 %v3251_v36  ;;  %v3284_v36 = vld [vmem:[%s4531_s18 + $0x60] sm:$0xf0] }
 0x7e2   : > { %v1660_v37 = vpop.permute.xlu0 %1659 }
 0x7e3   : > { %1672 = vmatpush.bf16.msrb.mxu3 %v1660_v37  ;;  %v3545_v37 = vld [vmem:[%s4531_s18 + $0x4] sm:$0xf] }
 0x7e4   : > { %1777 = vrot.lane.b32.xlu2 %v4689_v19, %s4167_s28 }
 0x837   : > { %v1655_v38 = vpop.xlane.xlu2 %1654 }
 0x838   : > { %3800 = vrcp.f32 %v1655_v38  ;;  %v3252_v38 = vld [vmem:[%s4531_s18 + $0x40] sm:$0xf0] }
 0x83e   : > { %v3801_v39 = vpop.eup %3800 }
 0x83f   : > { %v1657_v40 = vmul.f32 %v3801_v39, %v3793_v17  ;;  %v1714_v41 = vpop.xlane.xlu2 %1713  ;;  %v3327_v17 = vor.u32 %v3562_v13, %v3324_v15  ;;  %v3255_v39 = vor.u32 %v3545_v37, %v3252_v38  ;;  %v3354_v13 = vld [vmem:[%s4531_s18 + $0xa8] sm:$0xf]  ;;  %v3566_v15 = vld [vmem:[%s4531_s18 + $0xac] sm:$0xf] }
 0x840   : > { %3802 = vrcp.f32 %v1714_v41  ;;  %v3338_v41 = vld [vmem:[%s4531_s18 + $0x98] sm:$0xf] }
 0x841   : > { %v1658_v42 = vpack.c.bf16 %v1657_v40, %v1657_v40  ;;  %2141 = vmatpush.bf16.msra.mxu2 %v3327_v17 }
 0x843   : > { %3234 = vmatmul.msk.bf16.vlgmr.msrb.gmra.mxu3 %vm1603_vm2, %v1658_v42  ;;  %v3572_v42 = vld [vmem:[%s4531_s18 + $0xd4] sm:$0xf0] }
 0x846   : > { %v3803_v43 = vpop.eup %3802 }
 0x847   : > { %v1716_v45 = vmul.f32 %v3803_v43, %v3795_v23  ;;  %v1778_v46 = vpop.permute.xlu2 %1777  ;;  %v3319_v23 = vor.u32 %v3561_v20, %v3316_v21  ;;  %v3564_v43 = vld [vmem:[%s4531_s18 + $0x9c] sm:$0xf]  ;;  %v3359_v21 = vor.u32 %v3566_v15, %v3356_v11  ;;  %v3396_v11 = vld [vmem:[%s4582_s8 + $0x40] sm:$0xf0] }
 0x848   : > { %1790 = vmatpush.bf16.msra.mxu3 %v1778_v46  ;;  %v3339_v46 = vor.u32 %v3572_v42, %v3338_v41  ;;  %v3370_v41 = vld [vmem:[%s4531_s18 + $0xb8] sm:$0xf] }
 0x849   : > { %v1717_v47 = vpack.c.bf16 %v1716_v45, %v1716_v45  ;;  %2115 = vmatpush.bf16.msrb.mxu1 %v3319_v23  ;;  %v3290_v23 = vld [vmem:[%s4531_s18 + $0x28] sm:$0xf]  ;;  %v3576_v42 = vld [vmem:[%s4531_s18 + $0xf4] sm:$0xf0] }
 0x84a   : > { %v3291_v37 = vor.u32 %v3558_v25, %v3290_v23  ;;  %v3474_v23 = vld [vmem:[%s4582_s8 + $0x90] sm:$0xf] }
 0x84b   : > { %3236 = vmatmul.msk.bf16.vlgmr.msra.gmra.mxu0 %vm1603_vm2, %v1717_v47  ;;  %v3340_v47 = vld [vmem:[%s4531_s18 + $0xd8] sm:$0xf0]  ;;  %v3603_v25 = vld [vmem:[%s4582_s8 + $0xcc] sm:$0xf0] }
 0x84d   : > { %2116 = vmatpush.bf16.msrb.mxu1 %v3255_v39  ;;  %v3283_v39 = vor.u32 %v3557_v34, %v3282_v32  ;;  %v3482_v32 = vld [vmem:[%s4582_s8 + $0x98] sm:$0xf] }
 0x84e   : > { %v3604_v34 = vld [vmem:[%s4582_s8 + $0xd4] sm:$0xf0] }
 0x84f   : > { %v1773_v48 = vpop.xlane.xlu0 %1772 }
 0x850   : > { %3804 = vrcp.f32 %v1773_v48  ;;  %v1616_v49 = vpop.f32.mrf.mxu0  ;;  %v3330_v48 = vld [vmem:[%s4531_s18 + $0x90] sm:$0xf] }
 0x851   : > { %1620 = vst.msk [vmem:[#allocation3] sm:$0xf] %vm1222_vm7, %v1616_v49  ;;  %v3571_v49 = vld [vmem:[%s4531_s18 + $0xcc] sm:$0xf0] }
 0x856   : > { %v3805_v19 = vpop.eup %3804 }
 0x857   : > { %v1775_v50 = vmul.f32 %v3805_v19, %v3799_v35  ;;  %v3263_v35 = vor.u32 %v3546_v29, %v3260_v31  ;;  %v3343_v19 = vor.u32 %v3564_v43, %v3340_v47  ;;  %v3292_v31 = vld [vmem:[%s4531_s18 + $0x68] sm:$0xf0]  ;;  %v3568_v43 = vld [vmem:[%s4531_s18 + $0xbc] sm:$0xf]  ;;  %v3575_v47 = vld [vmem:[%s4531_s18 + $0xec] sm:$0xf0] }
 0x858   : > { %v1618_v51 = vpop.f32.mrf.mxu0 }
 0x859   : > { %v1776_v52 = vpack.c.bf16 %v1775_v50, %v1775_v50  ;;  %2142 = vmatpush.bf16.msra.mxu2 %v3263_v35  ;;  %v3331_v50 = vor.u32 %v3571_v49, %v3330_v48  ;;  %v3274_v51 = vld [vmem:[%s4531_s18 + $0x18] sm:$0xf]  ;;  %v3549_v35 = vld [vmem:[%s4531_s18 + $0x24] sm:$0xf]  ;;  %v3567_v48 = vld [vmem:[%s4531_s18 + $0xb4] sm:$0xf] }
 0x85a   : > { %v3364_v49 = vld [vmem:[%s4531_s18 + $0xf0] sm:$0xf0] }
 0x85b   : > { %3238 = vmatmul.msk.bf16.vlgmr.msra.gmra.mxu3 %vm1603_vm2, %v1776_v52  ;;  %v3556_v52 = vld [vmem:[%s4531_s18 + $0x54] sm:$0xf0]  ;;  %2154 = vmatpush.bf16.msra.mxu0 %v3331_v50 }
 0x8c6   : > { %v1674_v53 = vpop.f32.mrf.mxu3 }
 0x8c7   : > { %1679 = vrot.lane.b32.xlu1 %v1674_v53, %s4176_s29  ;;  %v3563_v53 = vld [vmem:[%s4531_s18 + $0x94] sm:$0xf] }
 0x8c8   : > { %v1733_v54 = vpop.f32.mrf.mxu0 }
 0x8ce   : > { %v1676_v55 = vpop.f32.mrf.mxu3 }
 0x8cf   : > { %1738 = vrot.lane.b32.xlu1 %v1733_v54, %s4178_s23  ;;  %v3275_v55 = vor.u32 %v3556_v52, %v3274_v51  ;;  %v3306_v51 = vld [vmem:[%s4531_s18 + $0x38] sm:$0xf] }
 0x8d0   : > { %v1735_v56 = vpop.f32.mrf.mxu0  ;;  %v3560_v52 = vld [vmem:[%s4531_s18 + $0x74] sm:$0xf0] }
 0x8d1   : > { %v3332_v56 = vld [vmem:[%s4531_s18 + $0xd0] sm:$0xf0] }
 0x8de   : > { %v1792_v4 = vpop.f32.mrf.mxu3 }
 0x8df   : > { %1797 = vrot.lane.b32.xlu2 %v1792_v4, %s4177_s7  ;;  %v3548_v4 = vld [vmem:[%s4531_s18 + $0x1c] sm:$0xf] }
 0x8e6   : > { %v1794_v27 = vpop.f32.mrf.mxu3 }
 0x8e7   : > { %v3335_v27 = vor.u32 %v3563_v53, %v3332_v56  ;;  %v3308_v56 = vld [vmem:[%s4531_s18 + $0x78] sm:$0xf0] }
 0x8e9   : > { %2167 = vmatpush.bf16.msra.mxu1 %v3335_v27  ;;  %v3559_v27 = vld [vmem:[%s4531_s18 + $0x6c] sm:$0xf0] }
 0x939   : > { %v1680_v28 = vpop.permute.xlu1 %1679  ;;  %v1798_v61 = vpop.permute.xlu2 %1797 }
 0x93a   : > { %1682 = vst.msk [vmem:[#allocation3] sm:$0xf] %vm1284_vm8, %v1680_v28  ;;  %v3555_v28 = vld [vmem:[%s4531_s18 + $0x4c] sm:$0xf0] }
 0x941   : > { %v1739_v60 = vpop.permute.xlu1 %1738 }
 0x942   : > { %1741 = vst.msk [vmem:[#allocation3] sm:$0xf] %vm1346_vm9, %v1739_v60  ;;  %v3279_v60 = vor.u32 %v3548_v4, %v3276_v57  ;;  %v3298_v4 = vld [vmem:[%s4531_s18 + $0x30] sm:$0xf]  ;;  %v3551_v57 = vld [vmem:[%s4531_s18 + $0x34] sm:$0xf] }
 0x943   : > { %1800 = vst.msk [vmem:[#allocation3] sm:$0xf] %vm1408_vm10, %v1798_v61  ;;  %v3267_v61 = vor.u32 %v3555_v28, %v3266_v58  ;;  %v3300_v58 = vld [vmem:[%s4531_s18 + $0x70] sm:$0xf0]  ;;  %v3307_v28 = vor.u32 %v3560_v52, %v3306_v51 }
 0x945   : > { %2155 = vmatpush.bf16.msra.mxu0 %v3267_v61  ;;  %v3299_v61 = vor.u32 %v3559_v27, %v3298_v4 }
 0x94a   : > { %v1801_v62 = vld [vmem:[#allocation3] sm:$0xf] }
 0x94b   : > { %v1802_v63 = vpack.c.bf16 %v1801_v62, %v1801_v62  ;;  %v3547_v62 = vld [vmem:[%s4531_s18 + $0x14] sm:$0xf] }
 0x94d   : > { %3247 = vmatmul.msk.bf16.vlgmr.msrb.gmra.mxu2 %vm1143_vm1, %v1802_v63  ;;  %v3268_v63 = vld [vmem:[%s4531_s18 + $0x50] sm:$0xf0] }
 0x94e   : > { %2193 = vmatpush.bf16.msrb.mxu2 %v3343_v19  ;;  %v3371_v19 = vor.u32 %v3576_v42, %v3370_v41  ;;  %v3579_v41 = vld [vmem:[%s4582_s8 + $0x14] sm:$0xf] }
 0x952   : > { %2194 = vmatpush.bf16.msrb.mxu2 %v3279_v60 }
 0x9d0   : > { %v1831_v1 = vpop.f32.mrf.mxu2 }
 0x9d1   : > { %v1835_v2 = vadd.f32 %v1831_v1, %v4705_v33  ;;  %v3322_v33 = vld [vmem:[%s4531_s18 + $0x88] sm:$0xf] }
 0x9d2   : > { %v3323_v14 = vor.u32 %v3570_v12, %v3322_v33 }
 0x9d3   : > { %v1837_v3 = vadd.f32 %v1836_v0, %v1835_v2  ;;  %v3271_v0 = vor.u32 %v3547_v62, %v3268_v63  ;;  %v3303_v62 = vor.u32 %v3551_v57, %v3300_v58  ;;  %v3458_v63 = vld [vmem:[%s4582_s8 + $0x80] sm:$0xf]  ;;  %v3597_v58 = vld [vmem:[%s4582_s8 + $0xa4] sm:$0xf] }
 0x9d4   : > { %2128 = vmatpush.bf16.msrb.mxu3 %v3323_v14  ;;  %v3574_v14 = vld [vmem:[%s4531_s18 + $0xe4] sm:$0xf0]  ;;  %v3605_v57 = vld [vmem:[%s4582_s8 + $0xdc] sm:$0xf0] }
 0x9d5   : > { %v1838_v5 = vsel %vm1447_vm11, %v1837_v3, 0.0  ;;  %2168 = vmatpush.bf16.msra.mxu1 %v3271_v0  ;;  %v3355_v20 = vor.u32 %v3574_v14, %v3354_v13  ;;  %v3601_v0 = vld [vmem:[%s4582_s8 + $0xbc] sm:$0xf0]  ;;  %v3577_v14 = vld [vmem:[%s4582_s8 + $0x4] sm:$0xf] }
 0x9d6   : > { %1839 = vadd.xlane.f32.xlu0 %v1838_v5  ;;  %v3585_v13 = vld [vmem:[%s4582_s8 + $0x3c] sm:$0xf0] }
 0x9d8   : > { %v1833_v6 = vpop.f32.mrf.mxu2  ;;  %2129 = vmatpush.bf16.msrb.mxu3 %v3259_v30  ;;  %v3550_v30 = vld [vmem:[%s4531_s18 + $0x2c] sm:$0xf] }
 0x9d9   : > { %v3295_v38 = vor.u32 %v3550_v30, %v3292_v31  ;;  %v3476_v30 = vld [vmem:[%s4582_s8 + $0xd0] sm:$0xf0] }
 0x9dc   : > { %2180 = vmatpush.bf16.msra.mxu3 %v3339_v46  ;;  %v3362_v46 = vld [vmem:[%s4531_s18 + $0xb0] sm:$0xf] }
 0x9dd   : > { %v3363_v53 = vor.u32 %v3575_v47, %v3362_v46  ;;  %v3418_v46 = vld [vmem:[%s4582_s8 + $0x18] sm:$0xf] }
 0x9de   : > { %v3588_v47 = vld [vmem:[%s4582_s8 + $0x54] sm:$0xf0] }
 0x9e0   : > { %2181 = vmatpush.bf16.msra.mxu3 %v3275_v55  ;;  %v3552_v55 = vld [vmem:[%s4531_s18 + $0x3c] sm:$0xf] }
 0x9e1   : > { %v3311_v60 = vor.u32 %v3552_v55, %v3308_v56  ;;  %v3490_v56 = vld [vmem:[%s4582_s8 + $0xa0] sm:$0xf] }
 0xa49   : > { %v1840_v7 = vpop.xlane.xlu0 %1839 }
 0xa4a   : > { %v1841_v8 = vmul.f32 %v1840_v7, %v4675_v59 }
 0xa4c   : > { %v4768_v9 = vsub.f32 %v1837_v3, %v1841_v8  ;;  %v1860_v8 = vperm.slane %v4696_v22, 1  ;;  %v3573_v22 = vld [vmem:[%s4531_s18 + $0xdc] sm:$0xf0] }
 0xa4d   : > { %v3347_v26 = vor.u32 %v3573_v22, %v3346_v16  ;;  %v3399_v16 = vor.u32 %v3577_v14, %v3396_v11  ;;  %v3402_v22 = vld [vmem:[%s4582_s8 + $0x8] sm:$0xf]  ;;  %v3500_v14 = vld [vmem:[%s4582_s8 + $0xe8] sm:$0xf0]  ;;  %v3589_v11 = vld [vmem:[%s4582_s8 + $0x5c] sm:$0xf0] }
 0xa4e   : > { %v1843_v44 = vmul.f32 %v4768_v9, %v4768_v9 }
 0xa50   : > { %v1844_v10 = vsel %vm1447_vm11, %v1843_v44, 0.0 }
 0xa51   : > { %1845 = vadd.xlane.f32.xlu1 %v1844_v10  ;;  %v1862_v10 = vperm.slane %v4699_v24, 1  ;;  %v3348_v24 = vld [vmem:[%s4531_s18 + $0xe0] sm:$0xf0] }
 0xa52   : > { %v3351_v29 = vor.u32 %v3565_v18, %v3348_v24  ;;  %v3586_v18 = vld [vmem:[%s4582_s8 + $0x44] sm:$0xf0]  ;;  %v3578_v24 = vld [vmem:[%s4582_s8 + $0xc] sm:$0xf] }
 0xac4   : > { %v1846_v40 = vpop.xlane.xlu1 %1845 }
 0xac5   : > { %v1847_v45 = vmul.f32 %v1846_v40, %v4675_v59  ;;  %v3287_v40 = vor.u32 %v3549_v35, %v3284_v36  ;;  %v3596_v35 = vld [vmem:[%s4582_s8 + $0x9c] sm:$0xf]  ;;  %v3483_v36 = vor.u32 %v3604_v34, %v3482_v32 }
 0xac7   : > { %v1848_v54 = vadd.f32 1e-05, %v1847_v45  ;;  %v3372_v45 = vld [vmem:[%s4531_s18 + $0xf8] sm:$0xf0]  ;;  %s5168_s18 = scalar_lea.vmem [#allocation14], %s4510_s19 }
 0xac8   : > { %v3375_v50 = vor.u32 %v3568_v43, %v3372_v45  ;;  %v3412_v43 = vld [vmem:[%s4582_s8 + $0x50] sm:$0xf0]  ;;  %s5169_s13 = smov %s5168_s18 }
 0xac9   : > { %3806 = vrsqrt.f32 %v1848_v54  ;;  %vm1855_vm5 = vweird.f32 %v1848_v54  ;;  %v3415_v45 = vor.u32 %v3579_v41, %v3412_v43  ;;  %v4913_v51 = vld [vmem:[%s5168_s18] sm:$0xff]  ;;  %v3436_v41 = vld [vmem:[%s4582_s8 + $0x68] sm:$0xf0] }
 0xaca   : > { %v1901_v52 = vperm.slane %v4913_v51, 0  ;;  %v3607_v43 = vld [vmem:[%s4582_s8 + $0xec] sm:$0xf0] }
 0xacf   : > { %v3807_v1 = vpop.eup %3806 }
 0xad0   : > { %v1850_v2 = vmul.f32 %v3807_v1, %v1848_v54  ;;  %vm1856_vm4 = vweird.f32 %v3807_v1  ;;  %v3367_v54 = vor.u32 %v3567_v48, %v3364_v49  ;;  %v3580_v48 = vld [vmem:[%s4582_s8 + $0x1c] sm:$0xf]  ;;  %v3419_v49 = vor.u32 %v3588_v47, %v3418_v46  ;;  %v3508_v46 = vld [vmem:[%s4582_s8 + $0xf0] sm:$0xf0] }
 0xad1   : > { %vm1857_vm7 = vmor %vm1855_vm5, %vm1856_vm4 }
 0xad2   : > { %v1851_v3 = vmul.f32 %v3807_v1, %v1850_v2  ;;  %v3460_v2 = vld [vmem:[%s4582_s8 + $0xc0] sm:$0xf0] }
 0xad4   : > { %v1852_v5 = vmul.f32 0.5, %v1851_v3  ;;  %v3466_v3 = vld [vmem:[%s4582_s8 + $0x88] sm:$0xf] }
 0xad6   : > { %v1853_v6 = vsub.f32 1.5, %v1852_v5  ;;  %v3602_v5 = vld [vmem:[%s4582_s8 + $0xc4] sm:$0xf0] }
 0xad8   : > { %v1854_v7 = vmul.f32 %v3807_v1, %v1853_v6  ;;  %v3594_v6 = vld [vmem:[%s4582_s8 + $0x8c] sm:$0xf] }
 0xada   : > { %v1858_v44 = vsel %vm1857_vm7, %v3807_v1, %v1854_v7  ;;  %v3593_v1 = vld [vmem:[%s4582_s8 + $0x84] sm:$0xf]  ;;  %v3468_v7 = vld [vmem:[%s4582_s8 + $0xc8] sm:$0xf0] }
 0xadb   : > { %v1859_v33 = vmul.f32 %v1858_v44, %v4768_v9  ;;  %v3463_v44 = vor.u32 %v3593_v1, %v3460_v2 }
 0xadd   : > { %v1861_v12 = vmul.f32 %v1860_v8, %v1859_v33  ;;  %v3459_v8 = vor.u32 %v3601_v0, %v3458_v63  ;;  %v3471_v33 = vor.u32 %v3594_v6, %v3468_v7  ;;  %v1904_v63 = vperm.slane %v4913_v51, 3  ;;  %v3498_v7 = vld [vmem:[%s4582_s8 + $0xa8] sm:$0xf] }
 0xade   : > { %v3491_v0 = vor.u32 %v3605_v57, %v3490_v56  ;;  %v3514_v57 = vld [vmem:[%s4582_s8 + $0xb8] sm:$0xf] }
 0xadf   : > { %v4814_v17 = vadd.f32 %v1862_v10, %v1861_v12  ;;  %v3467_v10 = vor.u32 %v3602_v5, %v3466_v3  ;;  %v3394_v12 = vld [vmem:[%s4582_s8] sm:$0xf] }
 0xae0   : > { %v3395_v15 = vor.u32 %v3585_v13, %v3394_v12  ;;  %v3598_v13 = vld [vmem:[%s4582_s8 + $0xac] sm:$0xf] }
 0xae1   : > { %v4821_v9 = vpack.c.bf16 %v4814_v17, %v4814_v17 }
 0xae3   : > { %3376 = vmatmul.msk.bf16.vlgmr.msrb.gmra.mxu0 %vm1143_vm1, %v4821_v9  ;;  %3377 = vmatmul.msk.bf16.vlgmr.msrb.gmra.mxu1 %vm1143_vm1, %v4821_v9 }
 0xae4   : > { %3378 = vmatmul.msk.bf16.vlgmr.msrb.gmra.mxu3 %vm1143_vm1, %v4821_v9  ;;  %3379 = vmatmul.msk.bf16.vlgmr.msra.gmra.mxu2 %vm1143_vm1, %v4821_v9 }
 0xae5   : > { %2232 = vmatpush.bf16.msrb.mxu3 %v3355_v20  ;;  %2245 = vmatpush.bf16.msra.mxu2 %v3359_v21  ;;  %v3403_v20 = vor.u32 %v3586_v18, %v3402_v22  ;;  %v3404_v21 = vld [vmem:[%s4582_s8 + $0x48] sm:$0xf0]  ;;  %v3428_v22 = vld [vmem:[%s4582_s8 + $0x60] sm:$0xf0] }
 0xae6   : > { %2206 = vmatpush.bf16.msrb.mxu0 %v3347_v26  ;;  %2219 = vmatpush.bf16.msrb.mxu1 %v3351_v29  ;;  %v3475_v26 = vor.u32 %v3603_v25, %v3474_v23  ;;  %v3595_v29 = vld [vmem:[%s4582_s8 + $0x94] sm:$0xf] }
 0xae7   : > { %v3479_v31 = vor.u32 %v3595_v29, %v3476_v30  ;;  %v1905_v29 = vperm.slane %v4913_v51, 4  ;;  %v1906_v30 = vperm.slane %v4913_v51, 5 }
 0xae9   : > { %2233 = vmatpush.bf16.msrb.mxu3 %v3291_v37  ;;  %2246 = vmatpush.bf16.msra.mxu2 %v3295_v38  ;;  %v3484_v37 = vld [vmem:[%s4582_s8 + $0xd8] sm:$0xf0] }
 0xaea   : > { %2207 = vmatpush.bf16.msrb.mxu0 %v3283_v39  ;;  %2220 = vmatpush.bf16.msrb.mxu1 %v3287_v40  ;;  %v3487_v38 = vor.u32 %v3596_v35, %v3484_v37  ;;  %v3410_v39 = vld [vmem:[%s4582_s8 + $0x10] sm:$0xf]  ;;  %v3590_v37 = vld [vmem:[%s4582_s8 + $0x64] sm:$0xf0] }
 0xaeb   : > { %v3587_v40 = vld [vmem:[%s4582_s8 + $0x4c] sm:$0xf0] }
 0xaec   : > { %v3411_v42 = vor.u32 %v3587_v40, %v3410_v39  ;;  %v3582_v40 = vld [vmem:[%s4582_s8 + $0x2c] sm:$0xf] }
 0xaf3   : > { %3380 = vmatmul.msk.bf16.vlgmr.msra.gmra.mxu0 %vm1143_vm1, %v4821_v9  ;;  %3381 = vmatmul.msk.bf16.vlgmr.msra.gmra.mxu1 %vm1143_vm1, %v4821_v9 }
 0xaf4   : > { %3382 = vmatmul.msk.bf16.vlgmr.msra.gmra.mxu3 %vm1143_vm1, %v4821_v9  ;;  %3383 = vmatmul.msk.bf16.vlgmr.msrb.gmra.mxu2 %vm1143_vm1, %v4821_v9 }
 0xaf5   : > { %2284 = vmatpush.bf16.msra.mxu3 %v3371_v19  ;;  %2297 = vmatpush.bf16.msrb.mxu2 %v3375_v50  ;;  %v3420_v19 = vld [vmem:[%s4582_s8 + $0x58] sm:$0xf0] }
 0xaf6   : > { %2258 = vmatpush.bf16.msra.mxu0 %v3363_v53  ;;  %2271 = vmatpush.bf16.msra.mxu1 %v3367_v54  ;;  %v3423_v50 = vor.u32 %v3580_v48, %v3420_v19  ;;  %v1902_v53 = vperm.slane %v4913_v51, 1  ;;  %v1908_v19 = vperm.slane %v4913_v51, 7 }
 0xaf9   : > { %2285 = vmatpush.bf16.msra.mxu3 %v3307_v28  ;;  %2298 = vmatpush.bf16.msrb.mxu2 %v3311_v60  ;;  %v3492_v28 = vld [vmem:[%s4582_s8 + $0xe0] sm:$0xf0] }
 0xafa   : > { %2259 = vmatpush.bf16.msra.mxu0 %v3299_v61  ;;  %2272 = vmatpush.bf16.msra.mxu1 %v3303_v62  ;;  %v1903_v62 = vperm.slane %v4913_v51, 2  ;;  %v3495_v1 = vor.u32 %v3597_v58, %v3492_v28 }
 0xb03   : > { %3384 = vmatmul.msk.bf16.vlgmr.msrb.gmra.mxu0 %vm1143_vm1, %v4821_v9  ;;  %3385 = vmatmul.msk.bf16.vlgmr.msrb.gmra.mxu1 %vm1143_vm1, %v4821_v9 }
 0xb04   : > { %3386 = vmatmul.msk.bf16.vlgmr.msrb.gmra.mxu3 %vm1143_vm1, %v4821_v9  ;;  %3387 = vmatmul.msk.bf16.vlgmr.msra.gmra.mxu2 %vm1143_vm1, %v4821_v9 }
 0xb05   : > { %2534 = vmatpush.bf16.xpose.msrb.mxu0 %v3459_v8  ;;  %2547 = vmatpush.bf16.xpose.msrb.mxu1 %v3463_v44  ;;  %v3606_v8 = vld [vmem:[%s4582_s8 + $0xe4] sm:$0xf0] }
 0xb06   : > { %2560 = vmatpush.bf16.xpose.msrb.mxu3 %v3467_v10  ;;  %2573 = vmatpush.bf16.xpose.msra.mxu2 %v3471_v33 }
 0xb0d   : > { %2535 = vmatpush.bf16.xpose.msrb.mxu0 %v3395_v15  ;;  %2548 = vmatpush.bf16.xpose.msrb.mxu1 %v3399_v16  ;;  %v3426_v15 = vld [vmem:[%s4582_s8 + $0x20] sm:$0xf]  ;;  %v3581_v16 = vld [vmem:[%s4582_s8 + $0x24] sm:$0xf] }
 0xb0e   : > { %2561 = vmatpush.bf16.xpose.msrb.mxu3 %v3403_v20  ;;  %v3499_v20 = vor.u32 %v3606_v8, %v3498_v7  ;;  %v3427_v25 = vor.u32 %v3589_v11, %v3426_v15  ;;  %v3444_v7 = vld [vmem:[%s4582_s8 + $0x70] sm:$0xf0] }
 0xb13   : > { %3388 = vmatmul.msk.bf16.vlgmr.msra.gmra.mxu0 %vm1143_vm1, %v4821_v9  ;;  %3389 = vmatmul.msk.bf16.vlgmr.msra.gmra.mxu1 %vm1143_vm1, %v4821_v9 }
 0xb14   : > { %3390 = vmatmul.msk.bf16.vlgmr.msra.gmra.mxu3 %vm1143_vm1, %v4821_v9  ;;  %3391 = vmatmul.msk.bf16.vlgmr.msrb.gmra.mxu2 %vm1143_vm1, %v4821_v9  ;;  %v3407_v9 = vor.u32 %v3578_v24, %v3404_v21  ;;  %v3503_v21 = vor.u32 %v3598_v13, %v3500_v14 }
 0xb15   : > { %2586 = vmatpush.bf16.xpose.msra.mxu0 %v3475_v26  ;;  %2599 = vmatpush.bf16.xpose.msra.mxu1 %v3479_v31  ;;  %v3431_v26 = vor.u32 %v3581_v16, %v3428_v22 }
 0xb16   : > { %2574 = vmatpush.bf16.xpose.msra.mxu2 %v3407_v9  ;;  %2612 = vmatpush.bf16.xpose.msra.mxu3 %v3483_v36  ;;  %v3434_v36 = vld [vmem:[%s4582_s8 + $0x28] sm:$0xf] }
 0xb1d   : > { %2587 = vmatpush.bf16.xpose.msra.mxu0 %v3411_v42  ;;  %2600 = vmatpush.bf16.xpose.msra.mxu1 %v3415_v45  ;;  %v3506_v42 = vld [vmem:[%s4582_s8 + $0xb0] sm:$0xf]  ;;  %v3599_v45 = vld [vmem:[%s4582_s8 + $0xb4] sm:$0xf] }
 0xb1e   : > { %2625 = vmatpush.bf16.xpose.msrb.mxu2 %v3487_v38  ;;  %2613 = vmatpush.bf16.xpose.msra.mxu3 %v3419_v49  ;;  %v1907_v49 = vperm.slane %v4913_v51, 6  ;;  %v3511_v56 = vor.u32 %v3599_v45, %v3508_v46 }
 0xb26   : > { %2626 = vmatpush.bf16.xpose.msrb.mxu2 %v3423_v50  ;;  %v3435_v50 = vor.u32 %v3590_v37, %v3434_v36 }
 0xb60   : > { %v2105_v54 = vpop.f32.mrf.mxu0  ;;  %v2118_v55 = vpop.f32.mrf.mxu1 }
 0xb61   : > { %v2106_v4 = vadd.f32 %v2105_v54, %v1901_v52  ;;  %v2119_v27 = vadd.f32 %v2118_v55, %v1902_v53  ;;  %v3439_v52 = vor.u32 %v3582_v40, %v3436_v41  ;;  %v3507_v55 = vor.u32 %v3607_v43, %v3506_v42 }
 0xb63   : > { %v2304_v60 = vmax.f32 %v2106_v4, 0.0  ;;  %v2305_v61 = vmax.f32 %v2119_v27, 0.0 }
 0xb65   : > { %v2320_v2 = vpack.c.bf16 %v2304_v60, %v2304_v60  ;;  %v2321_v3 = vpack.c.bf16 %v2305_v61, %v2305_v61  ;;  %v3608_v61 = vld [vmem:[%s4582_s8 + $0xf4] sm:$0xf0] }
 0xb66   : > { %v3515_v8 = vor.u32 %v3608_v61, %v3514_v57 }
 0xb67   : > { %v2131_v5 = vpop.f32.mrf.mxu3  ;;  %v2144_v6 = vpop.f32.mrf.mxu2  ;;  %2536 = vmatmul.bf16.vlgmr.msrb.gmra.mxu0 %v2320_v2  ;;  %2549 = vmatmul.bf16.vlgmr.msrb.gmra.mxu1 %v2321_v3  ;;  %v3591_v2 = vld [vmem:[%s4582_s8 + $0x6c] sm:$0xf0] }
 0xb68   : > { %v2132_v44 = vadd.f32 %v2131_v5, %v1903_v62  ;;  %v2145_v10 = vadd.f32 %v2144_v6, %v1904_v63  ;;  %v2107_v33 = vpop.f32.mrf.mxu0  ;;  %v2120_v12 = vpop.f32.mrf.mxu1  ;;  %2638 = vmatpush.bf16.xpose.msrb.mxu0 %v3491_v0  ;;  %2651 = vmatpush.bf16.xpose.msrb.mxu1 %v3495_v1  ;;  %v3600_v62 = vld [vmem:[%s4582_s8 + $0xbc] sm:$0xf]  ;;  %v3442_v1 = vld [vmem:[%s4582_s8 + $0x30] sm:$0xf]  ;;  %v3583_v6 = vld [vmem:[%s4582_s8 + $0x34] sm:$0xf] }
 0xb69   : > { %v3516_v63 = vld [vmem:[%s4582_s8 + $0xf8] sm:$0xf0]  ;;  %v3443_v14 = vor.u32 %v3591_v2, %v3442_v1  ;;  %v3447_v15 = vor.u32 %v3583_v6, %v3444_v7 }
 0xb6a   : > { %v2306_v18 = vmax.f32 %v2132_v44, 0.0  ;;  %v2307_v24 = vmax.f32 %v2145_v10, 0.0  ;;  %v4949_v0 = vld [vmem:[%s5169_s13 + $0x8] sm:$0xff]  ;;  %v3519_v44 = vor.u32 %v3600_v62, %v3516_v63 }
 0xb6b   : > { %v1909_v12 = vperm.slane %v4949_v0, 0  ;;  %v1910_v13 = vperm.slane %v4949_v0, 1  ;;  %v1916_v57 = vperm.slane %v4949_v0, 7 }
 0xb6c   : > { %v2322_v9 = vpack.c.bf16 %v2306_v18, %v2306_v18  ;;  %v2323_v23 = vpack.c.bf16 %v2307_v24, %v2307_v24  ;;  %v3450_v24 = vld [vmem:[%s4582_s8 + $0x38] sm:$0xf] }
 0xb6e   : > { %2562 = vmatmul.bf16.vlgmr.msrb.gmra.mxu3 %v2322_v9  ;;  %2575 = vmatmul.bf16.vlgmr.msra.gmra.mxu2 %v2323_v23  ;;  %v3592_v9 = vld [vmem:[%s4582_s8 + $0x74] sm:$0xf0]  ;;  %v3584_v23 = vld [vmem:[%s4582_s8 + $0x3c] sm:$0xf] }
 0xb6f   : > { %v2133_v31 = vpop.f32.mrf.mxu3  ;;  %v2146_v32 = vpop.f32.mrf.mxu2  ;;  %2664 = vmatpush.bf16.xpose.msrb.mxu3 %v3499_v20  ;;  %2677 = vmatpush.bf16.xpose.msra.mxu2 %v3503_v21 }
 0xb70   : > { %v2157_v34 = vpop.f32.mrf.mxu0  ;;  %v2170_v35 = vpop.f32.mrf.mxu1  ;;  %2639 = vmatpush.bf16.xpose.msrb.mxu0 %v3427_v25  ;;  %2652 = vmatpush.bf16.xpose.msrb.mxu1 %v3431_v26  ;;  %v3452_v25 = vld [vmem:[%s4582_s8 + $0x78] sm:$0xf0]  ;;  %v1912_v31 = vperm.slane %v4949_v0, 3  ;;  %v3451_v32 = vor.u32 %v3592_v9, %v3450_v24 }
 0xb71   : > { %v2158_v38 = vadd.f32 %v2157_v34, %v1905_v29  ;;  %v2171_v39 = vadd.f32 %v2170_v35, %v1906_v30  ;;  %v1911_v30 = vperm.slane %v4949_v0, 2  ;;  %v3455_v34 = vor.u32 %v3584_v23, %v3452_v25 }
 0xb73   : > { %v2308_v47 = vmax.f32 %v2158_v38, 0.0  ;;  %v2309_v48 = vmax.f32 %v2171_v39, 0.0 }
 0xb75   : > { %v2324_v53 = vpack.c.bf16 %v2308_v47, %v2308_v47  ;;  %v2325_v54 = vpack.c.bf16 %v2309_v48, %v2309_v48  ;;  %v1913_v48 = vperm.slane %v4949_v0, 4 }
 0xb77   : > { %v2183_v4 = vpop.f32.mrf.mxu3  ;;  %v2196_v27 = vpop.f32.mrf.mxu2  ;;  %2588 = vmatmul.bf16.vlgmr.msra.gmra.mxu0 %v2324_v53  ;;  %2601 = vmatmul.bf16.vlgmr.msra.gmra.mxu1 %v2325_v54 }
 0xb78   : > { %v2184_v58 = vadd.f32 %v2183_v4, %v1907_v49  ;;  %v2197_v51 = vadd.f32 %v2196_v27, %v1908_v19  ;;  %v2159_v28 = vpop.f32.mrf.mxu0  ;;  %v2172_v60 = vpop.f32.mrf.mxu1  ;;  %2665 = vmatpush.bf16.xpose.msrb.mxu3 %v3435_v50  ;;  %2678 = vmatpush.bf16.xpose.msra.mxu2 %v3439_v52  ;;  %v1914_v49 = vperm.slane %v4949_v0, 5  ;;  %v1915_v27 = vperm.slane %v4949_v0, 6 }
 0xb79   : > { %2690 = vmatpush.bf16.xpose.msra.mxu0 %v3507_v55  ;;  %2703 = vmatpush.bf16.xpose.msra.mxu1 %v3511_v56 }
 0xb7a   : > { %v2310_v3 = vmax.f32 %v2184_v58, 0.0  ;;  %v2311_v5 = vmax.f32 %v2197_v51, 0.0 }
 0xb7c   : > { %v2326_v10 = vpack.c.bf16 %v2310_v3, %v2310_v3  ;;  %v2327_v33 = vpack.c.bf16 %v2311_v5, %v2311_v5 }
 0xb7e   : > { %2614 = vmatmul.bf16.vlgmr.msra.gmra.mxu3 %v2326_v10  ;;  %2627 = vmatmul.bf16.vlgmr.msrb.gmra.mxu2 %v2327_v33 }
 0xb7f   : > { %v2185_v11 = vpop.f32.mrf.mxu3  ;;  %v2198_v16 = vpop.f32.mrf.mxu2 }
 0xb80   : > { %2716 = vmatpush.bf16.xpose.msra.mxu3 %v3515_v8  ;;  %2729 = vmatpush.bf16.xpose.msrb.mxu2 %v3519_v44  ;;  %v2209_v22 = vpop.f32.mrf.mxu0  ;;  %v2222_v18 = vpop.f32.mrf.mxu1 }
 0xb81   : > { %v2210_v20 = vadd.f32 %v2209_v22, %v1909_v12  ;;  %v2223_v21 = vadd.f32 %v2222_v18, %v1910_v13  ;;  %2691 = vmatpush.bf16.xpose.msra.mxu0 %v3443_v14  ;;  %2704 = vmatpush.bf16.xpose.msra.mxu1 %v3447_v15 }
 0xb83   : > { %v2312_v26 = vmax.f32 %v2210_v20, 0.0  ;;  %v2313_v29 = vmax.f32 %v2223_v21, 0.0 }
 0xb85   : > { %v2328_v35 = vpack.c.bf16 %v2312_v26, %v2312_v26  ;;  %v2329_v36 = vpack.c.bf16 %v2313_v29, %v2313_v29 }
 0xb87   : > { %v2235_v37 = vpop.f32.mrf.mxu3  ;;  %v2248_v38 = vpop.f32.mrf.mxu2  ;;  %2640 = vmatmul.bf16.vlgmr.msrb.gmra.mxu0 %v2328_v35  ;;  %2653 = vmatmul.bf16.vlgmr.msrb.gmra.mxu1 %v2329_v36 }
 0xb88   : > { %v2236_v39 = vadd.f32 %v2235_v37, %v1911_v30  ;;  %v2249_v40 = vadd.f32 %v2248_v38, %v1912_v31  ;;  %v2211_v41 = vpop.f32.mrf.mxu0  ;;  %v2224_v42 = vpop.f32.mrf.mxu1  ;;  %2717 = vmatpush.bf16.xpose.msra.mxu3 %v3451_v32  ;;  %2730 = vmatpush.bf16.xpose.msrb.mxu2 %v3455_v34 }
 0xb8a   : > { %v2314_v43 = vmax.f32 %v2236_v39, 0.0  ;;  %v2315_v45 = vmax.f32 %v2249_v40, 0.0 }
 0xb8c   : > { %v2330_v46 = vpack.c.bf16 %v2314_v43, %v2314_v43  ;;  %v2331_v47 = vpack.c.bf16 %v2315_v45, %v2315_v45 }
 0xb8e   : > { %2666 = vmatmul.bf16.vlgmr.msrb.gmra.mxu3 %v2330_v46  ;;  %2679 = vmatmul.bf16.vlgmr.msra.gmra.mxu2 %v2331_v47 }
 0xb8f   : > { %v2237_v19 = vpop.f32.mrf.mxu3  ;;  %v2250_v50 = vpop.f32.mrf.mxu2 }
 0xb90   : > { %v2261_v52 = vpop.f32.mrf.mxu0  ;;  %v2274_v53 = vpop.f32.mrf.mxu1 }
 0xb91   : > { %v2262_v54 = vadd.f32 %v2261_v52, %v1913_v48  ;;  %v2275_v55 = vadd.f32 %v2274_v53, %v1914_v49 }
 0xb93   : > { %v2316_v56 = vmax.f32 %v2262_v54, 0.0  ;;  %v2317_v4 = vmax.f32 %v2275_v55, 0.0 }
 0xb95   : > { %v2332_v58 = vpack.c.bf16 %v2316_v56, %v2316_v56  ;;  %v2333_v51 = vpack.c.bf16 %v2317_v4, %v2317_v4  ;;  %v3810_v4 = vld [vmem:[%s4570_s25] sm:$0x7]  ;;  %s5170_s25 = sld [smem:[#allocation26_spill]] }
 0xb97   : > { %v2287_v28 = vpop.f32.mrf.mxu3  ;;  %v2300_v60 = vpop.f32.mrf.mxu2  ;;  %2692 = vmatmul.bf16.vlgmr.msra.gmra.mxu0 %v2332_v58  ;;  %2705 = vmatmul.bf16.vlgmr.msra.gmra.mxu1 %v2333_v51 }
 0xb98   : > { %v2288_v61 = vadd.f32 %v2287_v28, %v1915_v27  ;;  %v2301_v62 = vadd.f32 %v2300_v60, %v1916_v57  ;;  %v2263_v63 = vpop.f32.mrf.mxu0  ;;  %v2276_v1 = vpop.f32.mrf.mxu1  ;;  %v2737_v27 = vperm.slane %v3810_v4, 2 }
 0xb9a   : > { %v2318_v2 = vmax.f32 %v2288_v61, 0.0  ;;  %v2319_v3 = vmax.f32 %v2301_v62, 0.0 }
 0xb9b   : > { %p3520_p10 = scmp.ne.s32.totalorder %s5170_s25, 1 }
 0xb9c   : > { %v2334_v5 = vpack.c.bf16 %v2318_v2, %v2318_v2  ;;  %v2335_v6 = vpack.c.bf16 %v2319_v3, %v2319_v3  ;;  %s5171_s8 = sld [smem:[#allocation56_spill]] (!%p3520_p10) }
 0xb9d   : > { %s5172_s7 = sld [smem:[#allocation39_spill]] (!%p3520_p10) }
 0xb9e   : > { %2718 = vmatmul.bf16.vlgmr.msra.gmra.mxu3 %v2334_v5  ;;  %2731 = vmatmul.bf16.vlgmr.msrb.gmra.mxu2 %v2335_v6  ;;  %s5173_s2 = sld [smem:[#allocation57_spill]] (!%p3520_p10) }
 0xb9f   : > { %v2289_v7 = vpop.f32.mrf.mxu3  ;;  %v2302_v8 = vpop.f32.mrf.mxu2 }
 0xbe4   : > { %v2537_v44 = vpop.f32.mrf.mxu0  ;;  %v2550_v0 = vpop.f32.mrf.mxu1 }
 0xbe5   : > { %v2551_v11 = vadd.f32 %v2550_v0, %v2537_v44 }
 0xbec   : > { %v2539_v10 = vpop.f32.mrf.mxu0  ;;  %v2552_v33 = vpop.f32.mrf.mxu1 }
 0xbed   : > { %v3811_v33 = vld [vmem:[%s4575_s17] sm:$0x7] }
 0xbf1   : > { %v2563_v12 = vpop.f32.mrf.mxu3  ;;  %v2576_v13 = vpop.f32.mrf.mxu2 }
 0xbf2   : > { %v2564_v16 = vadd.f32 %v2563_v12, %v2551_v11  ;;  %v2761_v12 = vperm.slane %v3811_v33, 2 }
 0xbf4   : > { %v2589_v14 = vpop.f32.mrf.mxu0  ;;  %v2602_v15 = vpop.f32.mrf.mxu1  ;;  %v2577_v24 = vadd.f32 %v2576_v13, %v2564_v16 }
 0xbf6   : > { %v2590_v9 = vadd.f32 %v2589_v14, %v2577_v24  ;;  %v3812_v14 = vld [vmem:[%s4580_s30] sm:$0x7] }
 0xbf8   : > { %v2603_v26 = vadd.f32 %v2602_v15, %v2590_v9  ;;  %v2763_v15 = vperm.slane %v3812_v14, 2 }
 0xbf9   : > { %v2565_v22 = vpop.f32.mrf.mxu3  ;;  %v2578_v18 = vpop.f32.mrf.mxu2 }
 0xbfc   : > { %v2591_v20 = vpop.f32.mrf.mxu0  ;;  %v2604_v21 = vpop.f32.mrf.mxu1 }
 0xc01   : > { %v2615_v23 = vpop.f32.mrf.mxu3  ;;  %v2628_v25 = vpop.f32.mrf.mxu2 }
 0xc02   : > { %v2616_v31 = vadd.f32 %v2615_v23, %v2603_v26 }
 0xc04   : > { %v2641_v29 = vpop.f32.mrf.mxu0  ;;  %v2654_v30 = vpop.f32.mrf.mxu1  ;;  %v2629_v35 = vadd.f32 %v2628_v25, %v2616_v31 }
 0xc06   : > { %v2642_v38 = vadd.f32 %v2641_v29, %v2629_v35 }
 0xc08   : > { %v2655_v41 = vadd.f32 %v2654_v30, %v2642_v38 }
 0xc09   : > { %v2617_v32 = vpop.f32.mrf.mxu3  ;;  %v2630_v34 = vpop.f32.mrf.mxu2 }
 0xc0c   : > { %v2643_v36 = vpop.f32.mrf.mxu0  ;;  %v2656_v37 = vpop.f32.mrf.mxu1 }
 0xc11   : > { %v2667_v39 = vpop.f32.mrf.mxu3  ;;  %v2680_v40 = vpop.f32.mrf.mxu2 }
 0xc12   : > { %v2668_v42 = vadd.f32 %v2667_v39, %v2655_v41 }
 0xc14   : > { %v2693_v43 = vpop.f32.mrf.mxu0  ;;  %v2706_v45 = vpop.f32.mrf.mxu1  ;;  %v2681_v46 = vadd.f32 %v2680_v40, %v2668_v42 }
 0xc16   : > { %v2694_v49 = vadd.f32 %v2693_v43, %v2681_v46 }
 0xc18   : > { %v2707_v52 = vadd.f32 %v2706_v45, %v2694_v49 }
 0xc19   : > { %v2669_v47 = vpop.f32.mrf.mxu3  ;;  %v2682_v48 = vpop.f32.mrf.mxu2 }
 0xc1c   : > { %v2695_v19 = vpop.f32.mrf.mxu0  ;;  %v2708_v50 = vpop.f32.mrf.mxu1 }
 0xc21   : > { %v2719_v53 = vpop.f32.mrf.mxu3  ;;  %v2732_v54 = vpop.f32.mrf.mxu2 }
 0xc22   : > { %v2720_v55 = vadd.f32 %v2719_v53, %v2707_v52 }
 0xc24   : > { %v2733_v56 = vadd.f32 %v2732_v54, %v2720_v55 }
 0xc26   : > { %v2736_v57 = vadd.f32 %v2733_v56, %v4814_v17 }
 0xc28   : > { %v2738_v58 = vadd.f32 %v2737_v27, %v2736_v57 }
 0xc29   : > { %v2721_v51 = vpop.f32.mrf.mxu3  ;;  %v2734_v28 = vpop.f32.mrf.mxu2 }
 0xc2a   : > { %v2739_v60 = vsel %vm1447_vm11, %v2738_v58, 0.0 }
 0xc2b   : > { %2740 = vadd.xlane.f32.xlu2 %v2739_v60 }
 0xc9e   : > { %v2741_v61 = vpop.xlane.xlu2 %2740 }
 0xc9f   : > { %v2742_v62 = vmul.f32 %v2741_v61, %v4675_v59 }
 0xca1   : > { %v2743_v63 = vsub.f32 %v2738_v58, %v2742_v62 }
 0xca3   : > { %v2744_v1 = vmul.f32 %v2743_v63, %v2743_v63 }
 0xca5   : > { %v2745_v2 = vsel %vm1447_vm11, %v2744_v1, 0.0 }
 0xca6   : > { %2746 = vadd.xlane.f32.xlu0 %v2745_v2 }
 0xd19   : > { %v2747_v3 = vpop.xlane.xlu0 %2746 }
 0xd1a   : > { %v2748_v5 = vmul.f32 %v2747_v3, %v4675_v59 }
 0xd1c   : > { %v2749_v17 = vadd.f32 1e-05, %v2748_v5 }
 0xd1e   : > { %3808 = vrsqrt.f32 %v2749_v17  ;;  %vm2756_vm9 = vweird.f32 %v2749_v17 }
 0xd24   : > { %v3809_v6 = vpop.eup %3808 }
 0xd25   : > { %v2751_v7 = vmul.f32 %v3809_v6, %v2749_v17  ;;  %vm2757_vm8 = vweird.f32 %v3809_v6 }
 0xd26   : > { %vm2758_vm10 = vmor %vm2756_vm9, %vm2757_vm8 }
 0xd27   : > { %v2752_v8 = vmul.f32 %v3809_v6, %v2751_v7 }
 0xd29   : > { %v2753_v44 = vmul.f32 0.5, %v2752_v8 }
 0xd2b   : > { %v2754_v0 = vsub.f32 1.5, %v2753_v44 }
 0xd2d   : > { %v2755_v10 = vmul.f32 %v3809_v6, %v2754_v0 }
 0xd2f   : > { %v2759_v13 = vsel %vm2758_vm10, %v3809_v6, %v2755_v10 }
 0xd30   : > { %v2760_v11 = vmul.f32 %v2759_v13, %v2743_v63 }
 0xd32   : > { %v2762_v16 = vmul.f32 %v2761_v12, %v2760_v11  ;;  %2769 = sbr.rel (%p3520_p10) target bundleno = 3759 (0xeaf), region = 144 }
 0xd34   : > { %v2764_v22 = vadd.f32 %v2763_v15, %v2762_v16 }
 0xd36   : > { %2765 = vst.msk [vmem:[#allocation2] sm:$0xf] %vm1447_vm11, %v2764_v22 }
 0xd37   : > { %v2770_v59 = vld [vmem:[#allocation4] sm:$0x1]  ;;  %v4180_v18 = vmov 0   ;;  %vm2783_vm12 = vcmask 1043456   ;;  %v2810_v24 = vld [vmem:[%s5171_s8 + $0x18] sm:$0xff]  ;;  %v2809_v20 = vld [vmem:[%s5171_s8 + $0x10] sm:$0xff] }
 0xd38   : > { %3813 = vset.pattern.permute.xlu0 %v4180_v18  ;;  %3521 = vmatpush.msk.msra.mxu0 %vm2783_vm12, %v2764_v22  ;;  %v2808_v21 = vld [vmem:[%s5171_s8 + $0x8] sm:$0xff]  ;;  %v2771_v23 = vld [vmem:[%s5172_s7] sm:$0x1]  ;;  %v4181_v26 = vmov 0.0   ;;  %vm2835_vm13 = vcmask 57344  }
 0xd39   : > { %2774 = vperm.xlu0 %3813, %v2770_v59   ;;  %2827 = vmatpush.msra.mxu1 %v2810_v24  ;;  %v2807_v30 = vld [vmem:[%s5171_s8] sm:$0xff] }
 0xd3a   : > { %v2811_v32 = vld [vmem:[%s5173_s2] sm:$0x1] }
 0xd3b   : > { %2828 = vmatpush.msra.mxu1 %v2809_v20 }
 0xd3d   : > { %2829 = vmatpush.msra.mxu1 %v2808_v21 }
 0xd3f   : > { %2830 = vmatpush.msra.mxu1 %v2807_v30 }
 0xdab   : > { %v2775_v9 = vpop.permute.xlu0 %2774 }
 0xdac   : > { %v2777_v25 = vperm.slane %v2775_v9, 0 }
 0xdae   : > { %vm2778_vm11 = vcmp.eq.f32.partialorder %v2777_v25, %v2771_v23 }
 0xdaf   : > { %v2779_v29 = vsel %vm2778_vm11, 0.25, %v4181_v26 }
 0xdb0   : > { %3522 = vmatmul.msk.f32.vlgmr.msra.gmra.mxu0 %vm1201_vm6, %v2779_v29 }
 0xe2d   : > { %v2804_v31 = vpop.f32.mrf.mxu0 }
 0xe2e   : > { %3523 = vmatmul.msk.f32.vlgmr.msra.gmra.mxu1 %vm1143_vm1, %v2804_v31 }
 0xeab   : > { %v2832_v34 = vpop.f32.mrf.mxu1 }
 0xeac   : > { %v2833_v35 = vadd.f32 %v2832_v34, %v2811_v32 }
 0xeae   : > { %2836 = vst.msk [vmem:[%s4586_s15] sm:$0x1] %vm2835_vm13, %v2833_v35 }
 0xeaf PF: > { %s5174_s5 = sld [smem:[#allocation58_spill]]  ;;  %s2848_s14 = sshll.u32 %s4586_s15, 4  ;;  %s2849_s14 = int_to_ptr.vmem [resolvable:$true] %s2848_s14 }
 0xeb0   : > { %s5177_s22 = sand.u32 1, %s4122_s4  }
 0xeb1   : > { %s2838_s18 = scalar_lea.sflag [#allocation7], %s5177_s22 }
 0xeb5   : > { %s5175_s11 = smov %s5174_s5  ;;  %s2846_s10 = scalar_lea.hbm %s5174_s5, %s4146_s6 }
 0xeb6   : > { %s2850_s27 = sshll.u32 %s2846_s10, 4  ;;  %s4044_s30 = scalar_lea.hbm %s5175_s11, 2  ;;  %s2851_s27 = int_to_ptr.hbm [resolvable:$true] %s2850_s27 }
 0xeb7   : > { %s4038_s13 = sshra.s32 %s2851_s27, 4  ;;  %s4039_s13 = int_to_ptr.hbm [resolvable:$true] %s4038_s13 }
 0xeb8   : > { %s4040_s25 = scalar_lea.hbm %s4039_s13, 1  ;;  %p4045_p1 = scmp.lt.s32.totalorder %s4039_s13, %s5175_s11 }
 0xeb9   : > { %p4041_p11 = scmp.ne.s32.totalorder %s4039_s13, %s4040_s25  ;;  %p4046_p4 = scmp.lt.s32.totalorder %s4044_s30, %s4040_s25 }
 0xebb   : > { %p4042_p13 = pnand %p4041_p11, %p4392_p12  ;;  %p4047_p3 = por %p4046_p4, %p4045_p1 }
 0xebd   : > { %p4043_p0 = pneg %p4042_p13 }
 0xebf   : > { %p4048_p5 = pnand %p4047_p3, %p4043_p0 }
 0xec1   : > { %4051 = shalt.err (!%p4048_p5)
}
 0xec2   : > { %3623 = dma.vmem_to_hbm [thread:$0]  (%p4392_p12), %s2849_s14, 16, %s2851_s27, %s2838_s18  }
 0xec3 PF: > { %s5178_s6 = sld [smem:[#allocation29_spill]] }
 0xec4   : > { %s5179_s15 = sld [smem:[#allocation23_spill]] }
 0xec9   : > { %p3652_p6 = scmp.ge.s32.totalorder %s5178_s6, 2 }
 0xeca   : > { %s2862_s0 = sand.u32 1, %s5179_s15  }
 0xecb   : > { %p3648_p7 = pnand %p3652_p6, %p4402_p2  ;;  %s2863_s29 = scalar_lea.sflag [#allocation7], %s2862_s0 }
 0xecd   : > { %p3649_p9 = pneg %p3648_p7 }
 0xecf   : > { %4113 = dma.done.wait (%p3649_p9), %s2863_s29, 16  }
 0xed0   : > { %4115 = vsyncadd (%p3649_p9), %s2863_s29, 4294967280  ;;  %s49_s2 = sadd.s32 1, %s5178_s6   ;;  %s5181_s7 = sld [smem:[#allocation24_spill]] }
 0xed1   : > { %p46_p8 = scmp.ge.s32.totalorder %s49_s2, 6   ;;  %s5182_s0 = sld [smem:[#allocation33_spill]] }
 0xed2   : > { %s5183_s20 = sld [smem:[#allocation25_spill]]  ;;  %s5189_s30 = smov %s4122_s4 }
 0xed3   : > { %s5184_s5 = sld [smem:[#allocation32_spill]]  ;;  %s5191_s23 = smov %s4134_s1 }
 0xed4   : > { %s5185_s24 = sld [smem:[#allocation27_spill]]  ;;  %48 = sbr.rel (!%p46_p8) target bundleno = 47 (0x2f), region = 257 }
 0xed5   : > { %s5186_s6 = sld [smem:[#allocation28_spill]] }
 0xed6   : > { %s5187_s25 = sld [smem:[#allocation30_spill]]  ;;  %s5190_s4 = smov %s5181_s7 }
 0xed7   : > { %s5188_s26 = sld [smem:[#allocation31_spill]] }
 0xed8   : > { %s5192_s1 = smov %s5183_s20 }
 0xed9   :  { %2868 = vsyncpa [#allocation6], 1 }
 0xeda   :  { %2870 = vsyncpa [#allocation6 + $0x1], 1 }
 0xedb   :  { %2871 = vsyncpa [#allocation9], 1 }
 0xedc   :  { %2873 = vsyncpa [#allocation9 + $0x1], 1 }
 0xedd   :  { %2874 = vsyncpa [#allocation12], 1 }
 0xede   :  { %2876 = vsyncpa [#allocation12 + $0x1], 1 }
 0xedf   :  { %2877 = vsyncpa [#allocation15], 1 }
 0xee0   :  { %2879 = vsyncpa [#allocation15 + $0x1], 1 }
 0xee1   :  { %2880 = vsyncpa [#allocation7], 1 }
 0xee2   :  { %2882 = vsyncpa [#allocation7 + $0x1], 1 }

</bundles_post_ra>
